<compile_context>
chip_gen: v6e
topology: v6e:2x2x1
jax: 0.10.0
libtpu: 0.0.40
codegen_flags: <defaults>
</compile_context>

<pallas_src>
import functools

import jax
import jax.numpy as jnp
from jax.experimental import pallas as pl
from jax.experimental.pallas import tpu as pltpu


# ----------------------------- in-kernel helpers -----------------------------

def _erf(z):
    # Abramowitz & Stegun 7.1.26 (max abs err ~1.5e-7). Uses only ops guaranteed to
    # lower on Mosaic (abs, mul/add, exp, where) — matches PyTorch's exact-GELU erf.
    a1, a2, a3, a4, a5 = (0.254829592, -0.284496736, 1.421413741,
                          -1.453152027, 1.061405429)
    pconst = 0.3275911
    az = jnp.abs(z)
    t = 1.0 / (1.0 + pconst * az)
    poly = t * (a1 + t * (a2 + t * (a3 + t * (a4 + t * a5))))
    e = 1.0 - poly * jnp.exp(-az * az)
    return jnp.where(z >= 0, e, -e)


def _gelu_exact(z):
    # PyTorch nn.GELU (approximate='none'): 0.5 * x * (1 + erf(x / sqrt(2)))
    return 0.5 * z * (1.0 + _erf(z * 0.7071067811865476))


def _layer_norm(v, gamma, beta, eps=1e-5):
    mu = jnp.mean(v, axis=-1, keepdims=True)
    cen = v - mu
    var = jnp.mean(cen * cen, axis=-1, keepdims=True)
    return cen * jax.lax.rsqrt(var + eps) * gamma + beta


# --------------------------------- kernel ------------------------------------

def _block_kernel(x_ref, wqkv_ref, wp_ref, w1_ref, w2_ref,
                  g1_ref, be1_ref, g2_ref, be2_ref,
                  bproj_ref, bfc1_ref, bfc2_ref, o_ref,
                  *, num_heads, compute_dtype):
    x = x_ref[0]                                   # (N, C) f32, one batch element
    n, c = x.shape
    d = c // num_heads
    scale = d ** -0.5

    # ---- LayerNorm 1 (f32) ----
    ln1 = _layer_norm(x, g1_ref[...], be1_ref[...])

    # ---- fused QKV projection: single MXU pass, weights already transposed ----
    qkv = jnp.dot(ln1.astype(compute_dtype), wqkv_ref[...],
                  preferred_element_type=jnp.float32)            # (N, 3C) f32

    # ---- per-head attention; head merge folded into the output projection ----
    attn_acc = jnp.zeros((n, c), jnp.float32)
    for h in range(num_heads):
        lo = h * d
        q_h = (qkv[:, lo:lo + d] * scale).astype(compute_dtype)          # (N, d)
        k_h = qkv[:, c + lo:c + lo + d].astype(compute_dtype)            # (N, d)
        v_h = qkv[:, 2 * c + lo:2 * c + lo + d].astype(compute_dtype)    # (N, d)

        # q_h @ k_h^T via dot_general (contract dim 1 of both) — no transpose copy.
        scores = jax.lax.dot_general(q_h, k_h, (((1,), (1,)), ((), ())),
                                     preferred_element_type=jnp.float32)  # (N, N)

        m = jnp.max(scores, axis=-1, keepdims=True)
        p = jnp.exp(scores - m)
        inv = pl.reciprocal(jnp.sum(p, axis=-1, keepdims=True), approx=True)
        attn = (p * inv).astype(compute_dtype)

        ctx = jnp.dot(attn, v_h, preferred_element_type=jnp.float32)      # (N, d)

        # merge heads implicitly: ctx_h @ rows [lo, lo+d) of Wproj^T
        attn_acc = attn_acc + jnp.dot(ctx.astype(compute_dtype),
                                      wp_ref[lo:lo + d, :],
                                      preferred_element_type=jnp.float32)

    x1 = x + attn_acc + bproj_ref[...]             # residual 1 (+ proj bias), f32

    # ---- LayerNorm 2 + MLP (exact GELU) ----
    ln2 = _layer_norm(x1, g2_ref[...], be2_ref[...])
    h1 = jnp.dot(ln2.astype(compute_dtype), w1_ref[...],
                 preferred_element_type=jnp.float32) + bfc1_ref[...]      # (N, hidden)
    a1 = _gelu_exact(h1)
    h2 = jnp.dot(a1.astype(compute_dtype), w2_ref[...],
                 preferred_element_type=jnp.float32) + bfc2_ref[...]      # (N, C)

    o_ref[0] = (x1 + h2).astype(o_ref.dtype)       # residual 2, lane-dense (N, C)


# -------------------------------- wrapper ------------------------------------

def block_forward(x, p, *, num_heads, compute_dtype=jnp.bfloat16):
    """x: (B, N, C) float32. p: dict of PyTorch-layout parameters. Returns (B, N, C)."""
    B, N, C = x.shape
    assert C % num_heads == 0
    hidden = p["w_fc1"].shape[0]

    # Pre-fuse / pre-transpose weights once in HBM (outside the kernel), cast MXU
    # operands to bf16 (halves weight DMA bytes; accumulation stays f32 in-kernel).
    wqkv_t = jnp.concatenate([p["wq"], p["wk"], p["wv"]], axis=0).T.astype(compute_dtype)  # (C, 3C)
    wp_t = p["w_proj"].T.astype(compute_dtype)                                             # (C, C)
    w1_t = p["w_fc1"].T.astype(compute_dtype)                                              # (C, hidden)
    w2_t = p["w_fc2"].T.astype(compute_dtype)                                              # (hidden, C)

    f32 = jnp.float32
    g1 = p["ln1_g"].reshape(1, C).astype(f32)
    be1 = p["ln1_b"].reshape(1, C).astype(f32)
    g2 = p["ln2_g"].reshape(1, C).astype(f32)
    be2 = p["ln2_b"].reshape(1, C).astype(f32)
    bproj = p["b_proj"].reshape(1, C).astype(f32)
    bfc1 = p["b_fc1"].reshape(1, hidden).astype(f32)
    bfc2 = p["b_fc2"].reshape(1, C).astype(f32)

    kernel = functools.partial(_block_kernel, num_heads=num_heads,
                               compute_dtype=compute_dtype)
    const = lambda b: (0, 0)

    return pl.pallas_call(
        kernel,
        out_shape=jax.ShapeDtypeStruct((B, N, C), x.dtype),
        grid_spec=pltpu.PrefetchScalarGridSpec(
            num_scalar_prefetch=0,
            grid=(B,),
            in_specs=[
                pl.BlockSpec((1, N, C), lambda b: (b, 0, 0)),   # x (one batch element)
                pl.BlockSpec((C, 3 * C), const),                 # fused Wqkv^T
                pl.BlockSpec((C, C), const),                     # Wproj^T
                pl.BlockSpec((C, hidden), const),                # Wfc1^T
                pl.BlockSpec((hidden, C), const),                # Wfc2^T
                pl.BlockSpec((1, C), const),                     # ln1 gamma
                pl.BlockSpec((1, C), const),                     # ln1 beta
                pl.BlockSpec((1, C), const),                     # ln2 gamma
                pl.BlockSpec((1, C), const),                     # ln2 beta
                pl.BlockSpec((1, C), const),                     # proj bias
                pl.BlockSpec((1, hidden), const),                # fc1 bias
                pl.BlockSpec((1, C), const),                     # fc2 bias
            ],
            out_specs=pl.BlockSpec((1, N, C), lambda b: (b, 0, 0)),
        ),
        compiler_params=pltpu.CompilerParams(
            dimension_semantics=("parallel",),
            vmem_limit_bytes=64 * 1024 * 1024,
        ),
    )(x, wqkv_t, wp_t, w1_t, w2_t, g1, be1, g2, be2, bproj, bfc1, bfc2)


# ------------------------------ pure-JAX reference ----------------------------

def block_reference(x, p, *, num_heads):
    """Pure-JAX mirror of the PyTorch Block.forward (eval, y=None, attn_mask=None)."""
    B, N, C = x.shape
    d = C // num_heads

    def ln(v, g, b):
        mu = v.mean(-1, keepdims=True)
        var = ((v - mu) ** 2).mean(-1, keepdims=True)
        return (v - mu) / jnp.sqrt(var + 1e-5) * g + b

    h = ln(x, p["ln1_g"], p["ln1_b"])
    q = h @ p["wq"].T
    k = h @ p["wk"].T
    v = h @ p["wv"].T
    q = q.reshape(B, N, num_heads, d).transpose(0, 2, 1, 3)
    k = k.reshape(B, N, num_heads, d).transpose(0, 2, 1, 3)
    v = v.reshape(B, N, num_heads, d).transpose(0, 2, 1, 3)
    scores = jnp.einsum("bhnd,bhmd->bhnm", q, k) * (d ** -0.5)
    attn = jax.nn.softmax(scores, axis=-1)
    ctx = jnp.einsum("bhnm,bhmd->bhnd", attn, v)
    ctx = ctx.transpose(0, 2, 1, 3).reshape(B, N, C)
    x1 = x + ctx @ p["w_proj"].T + p["b_proj"]

    z = ln(x1, p["ln2_g"], p["ln2_b"])
    z = z @ p["w_fc1"].T + p["b_fc1"]
    z = 0.5 * z * (1.0 + jax.scipy.special.erf(z / jnp.sqrt(2.0)))   # exact GELU
    z = z @ p["w_fc2"].T + p["b_fc2"]
    return x1 + z


# ---------------------------------- demo --------------------------------------

if __name__ == "__main__":
    B, N, C = 2, 16, 128
    num_heads = 4
    hidden = int(4.0 * C)          # mlp_ratio = 4.0

    key = jax.random.PRNGKey(0)
    ks = jax.random.split(key, 14)
    s = 0.05
    x = jax.random.normal(ks[0], (B, N, C), dtype=jnp.float32)
    params = {
        "ln1_g": 1.0 + s * jax.random.normal(ks[1], (C,), jnp.float32),
        "ln1_b": s * jax.random.normal(ks[2], (C,), jnp.float32),
        "wq": s * jax.random.normal(ks[3], (C, C), jnp.float32),
        "wk": s * jax.random.normal(ks[4], (C, C), jnp.float32),
        "wv": s * jax.random.normal(ks[5], (C, C), jnp.float32),
        "w_proj": s * jax.random.normal(ks[6], (C, C), jnp.float32),
        "b_proj": s * jax.random.normal(ks[7], (C,), jnp.float32),
        "ln2_g": 1.0 + s * jax.random.normal(ks[8], (C,), jnp.float32),
        "ln2_b": s * jax.random.normal(ks[9], (C,), jnp.float32),
        "w_fc1": s * jax.random.normal(ks[10], (hidden, C), jnp.float32),
        "b_fc1": s * jax.random.normal(ks[11], (hidden,), jnp.float32),
        "w_fc2": s * jax.random.normal(ks[12], (C, hidden), jnp.float32),
        "b_fc2": s * jax.random.normal(ks[13], (C,), jnp.float32),
    }

    out = block_forward(x, params, num_heads=num_heads)
    out = jax.block_until_ready(out)

    ref = block_reference(x, params, num_heads=num_heads)
    assert out.shape == (B, N, C)
    max_err = float(jnp.max(jnp.abs(out - ref)))
    # Tolerance sized for bf16 MXU operands (f32 accumulation; LN/softmax/GELU/residuals
    # are computed in f32). Structural bugs would produce O(1) errors and still fail.
    assert jnp.allclose(out, ref, atol=2.5e-2, rtol=2.5e-2), (
        f"mismatch vs reference, max abs err = {max_err}")

    print("KERNEL_OK")
</pallas_src>

<mosaic_0001>
module attributes {stable_mosaic.version = 11 : i64} {
  func.func @_block_kernel(%arg0: i32, %arg1: memref<1x16x128xf32, #tpu.memory_space<vmem>>, %arg2: memref<128x384xbf16, #tpu.memory_space<vmem>>, %arg3: memref<128x128xbf16, #tpu.memory_space<vmem>>, %arg4: memref<128x512xbf16, #tpu.memory_space<vmem>>, %arg5: memref<512x128xbf16, #tpu.memory_space<vmem>>, %arg6: memref<1x128xf32, #tpu.memory_space<vmem>>, %arg7: memref<1x128xf32, #tpu.memory_space<vmem>>, %arg8: memref<1x128xf32, #tpu.memory_space<vmem>>, %arg9: memref<1x128xf32, #tpu.memory_space<vmem>>, %arg10: memref<1x128xf32, #tpu.memory_space<vmem>>, %arg11: memref<1x512xf32, #tpu.memory_space<vmem>>, %arg12: memref<1x128xf32, #tpu.memory_space<vmem>>, %arg13: memref<1x16x128xf32, #tpu.memory_space<vmem>>) attributes {dimension_semantics = [#tpu.dimension_semantics<parallel>], iteration_bounds = array<i64: 2>, scalar_prefetch = 0 : i64, scratch_operands = 0 : i64, tpu.core_type = #tpu.core_type<tc>, window_params = [{transform_indices = @transform_0, window_bounds = array<i64: 1, 16, 128>}, {pipeline_mode = #tpu.pipeline_mode<synchronous>, transform_indices = @transform_1, window_bounds = array<i64: 128, 384>}, {pipeline_mode = #tpu.pipeline_mode<synchronous>, transform_indices = @transform_2, window_bounds = array<i64: 128, 128>}, {pipeline_mode = #tpu.pipeline_mode<synchronous>, transform_indices = @transform_3, window_bounds = array<i64: 128, 512>}, {pipeline_mode = #tpu.pipeline_mode<synchronous>, transform_indices = @transform_4, window_bounds = array<i64: 512, 128>}, {pipeline_mode = #tpu.pipeline_mode<synchronous>, transform_indices = @transform_5, window_bounds = array<i64: 1, 128>}, {pipeline_mode = #tpu.pipeline_mode<synchronous>, transform_indices = @transform_6, window_bounds = array<i64: 1, 128>}, {pipeline_mode = #tpu.pipeline_mode<synchronous>, transform_indices = @transform_7, window_bounds = array<i64: 1, 128>}, {pipeline_mode = #tpu.pipeline_mode<synchronous>, transform_indices = @transform_8, window_bounds = array<i64: 1, 128>}, {pipeline_mode = #tpu.pipeline_mode<synchronous>, transform_indices = @transform_9, window_bounds = array<i64: 1, 128>}, {pipeline_mode = #tpu.pipeline_mode<synchronous>, transform_indices = @transform_10, window_bounds = array<i64: 1, 512>}, {pipeline_mode = #tpu.pipeline_mode<synchronous>, transform_indices = @transform_11, window_bounds = array<i64: 1, 128>}, {transform_indices = @transform_12, window_bounds = array<i64: 1, 16, 128>}]} {
    %c0 = arith.constant 0 : index
    %c0_0 = arith.constant 0 : index
    %c0_1 = arith.constant 0 : index
    %0 = vector.load %arg1[%c0, %c0_0, %c0_1] : memref<1x16x128xf32, #tpu.memory_space<vmem>>, vector<1x16x128xf32>
    %1 = vector.shape_cast %0 : vector<1x16x128xf32> to vector<16x128xf32>
    %c0_2 = arith.constant 0 : index
    %c0_3 = arith.constant 0 : index
    %2 = vector.load %arg6[%c0_2, %c0_3] : memref<1x128xf32, #tpu.memory_space<vmem>>, vector<1x128xf32>
    %c0_4 = arith.constant 0 : index
    %c0_5 = arith.constant 0 : index
    %3 = vector.load %arg7[%c0_4, %c0_5] : memref<1x128xf32, #tpu.memory_space<vmem>>, vector<1x128xf32>
    %cst = arith.constant dense<0.000000e+00> : vector<16xf32>
    %4 = vector.multi_reduction <add>, %1, %cst [1] : vector<16x128xf32> to vector<16xf32>
    %5 = vector.shape_cast %4 : vector<16xf32> to vector<16x1xf32>
    %cst_6 = arith.constant 1.280000e+02 : f32
    %6 = vector.broadcast %cst_6 : f32 to vector<16x1xf32>
    %7 = arith.divf %5, %6 : vector<16x1xf32>
    %8 = vector.broadcast %7 : vector<16x1xf32> to vector<16x128xf32>
    %9 = arith.subf %1, %8 : vector<16x128xf32>
    %10 = arith.mulf %9, %9 : vector<16x128xf32>
    %cst_7 = arith.constant dense<0.000000e+00> : vector<16xf32>
    %11 = vector.multi_reduction <add>, %10, %cst_7 [1] : vector<16x128xf32> to vector<16xf32>
    %12 = vector.shape_cast %11 : vector<16xf32> to vector<16x1xf32>
    %cst_8 = arith.constant 1.280000e+02 : f32
    %13 = vector.broadcast %cst_8 : f32 to vector<16x1xf32>
    %14 = arith.divf %12, %13 : vector<16x1xf32>
    %cst_9 = arith.constant 9.99999974E-6 : f32
    %15 = vector.broadcast %cst_9 : f32 to vector<16x1xf32>
    %16 = arith.addf %14, %15 : vector<16x1xf32>
    %17 = math.rsqrt %16 : vector<16x1xf32>
    %18 = vector.broadcast %17 : vector<16x1xf32> to vector<16x128xf32>
    %19 = arith.mulf %9, %18 : vector<16x128xf32>
    %20 = vector.broadcast %2 : vector<1x128xf32> to vector<16x128xf32>
    %21 = arith.mulf %19, %20 : vector<16x128xf32>
    %22 = vector.broadcast %3 : vector<1x128xf32> to vector<16x128xf32>
    %23 = arith.addf %21, %22 : vector<16x128xf32>
    %24 = arith.truncf %23 : vector<16x128xf32> to vector<16x128xbf16>
    %c0_10 = arith.constant 0 : index
    %c0_11 = arith.constant 0 : index
    %25 = vector.load %arg2[%c0_10, %c0_11] : memref<128x384xbf16, #tpu.memory_space<vmem>>, vector<128x384xbf16>
    %cst_12 = arith.constant dense<0.000000e+00> : vector<16x384xf32>
    %26 = tpu.matmul %24, %25, %cst_12 {dimension_numbers = #tpu.dot_dimension_numbers<[1], [0], [0], [1], [0, 0, 1, 1], [], []>} : vector<16x128xbf16>, vector<128x384xbf16>, vector<16x384xf32> -> vector<16x384xf32>
    %cst_13 = arith.constant 0.000000e+00 : f32
    %27 = vector.broadcast %cst_13 : f32 to vector<16x128xf32>
    %28 = vector.extract_strided_slice %26 {offsets = [0, 0], sizes = [16, 32], strides = [1, 1]} : vector<16x384xf32> to vector<16x32xf32>
    %cst_14 = arith.constant 0.176776692 : f32
    %29 = vector.broadcast %cst_14 : f32 to vector<16x32xf32>
    %30 = arith.mulf %28, %29 : vector<16x32xf32>
    %31 = arith.truncf %30 : vector<16x32xf32> to vector<16x32xbf16>
    %32 = vector.extract_strided_slice %26 {offsets = [0, 128], sizes = [16, 32], strides = [1, 1]} : vector<16x384xf32> to vector<16x32xf32>
    %33 = arith.truncf %32 : vector<16x32xf32> to vector<16x32xbf16>
    %34 = vector.extract_strided_slice %26 {offsets = [0, 256], sizes = [16, 32], strides = [1, 1]} : vector<16x384xf32> to vector<16x32xf32>
    %35 = arith.truncf %34 : vector<16x32xf32> to vector<16x32xbf16>
    %cst_15 = arith.constant dense<0.000000e+00> : vector<16x16xf32>
    %36 = tpu.matmul %31, %33, %cst_15 {dimension_numbers = #tpu.dot_dimension_numbers<[1], [1], [0], [0], [0, 0, 1, 0], [], []>} : vector<16x32xbf16>, vector<16x32xbf16>, vector<16x16xf32> -> vector<16x16xf32>
    %cst_16 = arith.constant dense<0xFF800000> : vector<16xf32>
    %37 = vector.multi_reduction <maximumf>, %36, %cst_16 [1] : vector<16x16xf32> to vector<16xf32>
    %38 = vector.shape_cast %37 : vector<16xf32> to vector<16x1xf32>
    %39 = vector.broadcast %38 : vector<16x1xf32> to vector<16x16xf32>
    %40 = arith.subf %36, %39 : vector<16x16xf32>
    %41 = math.exp %40 : vector<16x16xf32>
    %cst_17 = arith.constant dense<0.000000e+00> : vector<16xf32>
    %42 = vector.multi_reduction <add>, %41, %cst_17 [1] : vector<16x16xf32> to vector<16xf32>
    %43 = vector.shape_cast %42 : vector<16xf32> to vector<16x1xf32>
    %44 = tpu.reciprocal %43 {approx = true} : vector<16x1xf32> -> vector<16x1xf32>
    %45 = vector.broadcast %44 : vector<16x1xf32> to vector<16x16xf32>
    %46 = arith.mulf %41, %45 : vector<16x16xf32>
    %47 = arith.truncf %46 : vector<16x16xf32> to vector<16x16xbf16>
    %cst_18 = arith.constant dense<0.000000e+00> : vector<16x32xf32>
    %48 = tpu.matmul %47, %35, %cst_18 {dimension_numbers = #tpu.dot_dimension_numbers<[1], [0], [0], [1], [0, 0, 1, 1], [], []>} : vector<16x16xbf16>, vector<16x32xbf16>, vector<16x32xf32> -> vector<16x32xf32>
    %49 = arith.truncf %48 : vector<16x32xf32> to vector<16x32xbf16>
    %c0_19 = arith.constant 0 : index
    %c0_20 = arith.constant 0 : index
    %50 = vector.load %arg3[%c0_19, %c0_20] : memref<128x128xbf16, #tpu.memory_space<vmem>>, vector<32x128xbf16>
    %cst_21 = arith.constant dense<0.000000e+00> : vector<16x128xf32>
    %51 = tpu.matmul %49, %50, %cst_21 {dimension_numbers = #tpu.dot_dimension_numbers<[1], [0], [0], [1], [0, 0, 1, 1], [], []>} : vector<16x32xbf16>, vector<32x128xbf16>, vector<16x128xf32> -> vector<16x128xf32>
    %52 = arith.addf %27, %51 : vector<16x128xf32>
    %53 = vector.extract_strided_slice %26 {offsets = [0, 32], sizes = [16, 32], strides = [1, 1]} : vector<16x384xf32> to vector<16x32xf32>
    %cst_22 = arith.constant 0.176776692 : f32
    %54 = vector.broadcast %cst_22 : f32 to vector<16x32xf32>
    %55 = arith.mulf %53, %54 : vector<16x32xf32>
    %56 = arith.truncf %55 : vector<16x32xf32> to vector<16x32xbf16>
    %57 = vector.extract_strided_slice %26 {offsets = [0, 160], sizes = [16, 32], strides = [1, 1]} : vector<16x384xf32> to vector<16x32xf32>
    %58 = arith.truncf %57 : vector<16x32xf32> to vector<16x32xbf16>
    %59 = vector.extract_strided_slice %26 {offsets = [0, 288], sizes = [16, 32], strides = [1, 1]} : vector<16x384xf32> to vector<16x32xf32>
    %60 = arith.truncf %59 : vector<16x32xf32> to vector<16x32xbf16>
    %cst_23 = arith.constant dense<0.000000e+00> : vector<16x16xf32>
    %61 = tpu.matmul %56, %58, %cst_23 {dimension_numbers = #tpu.dot_dimension_numbers<[1], [1], [0], [0], [0, 0, 1, 0], [], []>} : vector<16x32xbf16>, vector<16x32xbf16>, vector<16x16xf32> -> vector<16x16xf32>
    %cst_24 = arith.constant dense<0xFF800000> : vector<16xf32>
    %62 = vector.multi_reduction <maximumf>, %61, %cst_24 [1] : vector<16x16xf32> to vector<16xf32>
    %63 = vector.shape_cast %62 : vector<16xf32> to vector<16x1xf32>
    %64 = vector.broadcast %63 : vector<16x1xf32> to vector<16x16xf32>
    %65 = arith.subf %61, %64 : vector<16x16xf32>
    %66 = math.exp %65 : vector<16x16xf32>
    %cst_25 = arith.constant dense<0.000000e+00> : vector<16xf32>
    %67 = vector.multi_reduction <add>, %66, %cst_25 [1] : vector<16x16xf32> to vector<16xf32>
    %68 = vector.shape_cast %67 : vector<16xf32> to vector<16x1xf32>
    %69 = tpu.reciprocal %68 {approx = true} : vector<16x1xf32> -> vector<16x1xf32>
    %70 = vector.broadcast %69 : vector<16x1xf32> to vector<16x16xf32>
    %71 = arith.mulf %66, %70 : vector<16x16xf32>
    %72 = arith.truncf %71 : vector<16x16xf32> to vector<16x16xbf16>
    %cst_26 = arith.constant dense<0.000000e+00> : vector<16x32xf32>
    %73 = tpu.matmul %72, %60, %cst_26 {dimension_numbers = #tpu.dot_dimension_numbers<[1], [0], [0], [1], [0, 0, 1, 1], [], []>} : vector<16x16xbf16>, vector<16x32xbf16>, vector<16x32xf32> -> vector<16x32xf32>
    %74 = arith.truncf %73 : vector<16x32xf32> to vector<16x32xbf16>
    %c32 = arith.constant 32 : index
    %c0_27 = arith.constant 0 : index
    %75 = vector.load %arg3[%c32, %c0_27] : memref<128x128xbf16, #tpu.memory_space<vmem>>, vector<32x128xbf16>
    %cst_28 = arith.constant dense<0.000000e+00> : vector<16x128xf32>
    %76 = tpu.matmul %74, %75, %cst_28 {dimension_numbers = #tpu.dot_dimension_numbers<[1], [0], [0], [1], [0, 0, 1, 1], [], []>} : vector<16x32xbf16>, vector<32x128xbf16>, vector<16x128xf32> -> vector<16x128xf32>
    %77 = arith.addf %52, %76 : vector<16x128xf32>
    %78 = vector.extract_strided_slice %26 {offsets = [0, 64], sizes = [16, 32], strides = [1, 1]} : vector<16x384xf32> to vector<16x32xf32>
    %cst_29 = arith.constant 0.176776692 : f32
    %79 = vector.broadcast %cst_29 : f32 to vector<16x32xf32>
    %80 = arith.mulf %78, %79 : vector<16x32xf32>
    %81 = arith.truncf %80 : vector<16x32xf32> to vector<16x32xbf16>
    %82 = vector.extract_strided_slice %26 {offsets = [0, 192], sizes = [16, 32], strides = [1, 1]} : vector<16x384xf32> to vector<16x32xf32>
    %83 = arith.truncf %82 : vector<16x32xf32> to vector<16x32xbf16>
    %84 = vector.extract_strided_slice %26 {offsets = [0, 320], sizes = [16, 32], strides = [1, 1]} : vector<16x384xf32> to vector<16x32xf32>
    %85 = arith.truncf %84 : vector<16x32xf32> to vector<16x32xbf16>
    %cst_30 = arith.constant dense<0.000000e+00> : vector<16x16xf32>
    %86 = tpu.matmul %81, %83, %cst_30 {dimension_numbers = #tpu.dot_dimension_numbers<[1], [1], [0], [0], [0, 0, 1, 0], [], []>} : vector<16x32xbf16>, vector<16x32xbf16>, vector<16x16xf32> -> vector<16x16xf32>
    %cst_31 = arith.constant dense<0xFF800000> : vector<16xf32>
    %87 = vector.multi_reduction <maximumf>, %86, %cst_31 [1] : vector<16x16xf32> to vector<16xf32>
    %88 = vector.shape_cast %87 : vector<16xf32> to vector<16x1xf32>
    %89 = vector.broadcast %88 : vector<16x1xf32> to vector<16x16xf32>
    %90 = arith.subf %86, %89 : vector<16x16xf32>
    %91 = math.exp %90 : vector<16x16xf32>
    %cst_32 = arith.constant dense<0.000000e+00> : vector<16xf32>
    %92 = vector.multi_reduction <add>, %91, %cst_32 [1] : vector<16x16xf32> to vector<16xf32>
    %93 = vector.shape_cast %92 : vector<16xf32> to vector<16x1xf32>
    %94 = tpu.reciprocal %93 {approx = true} : vector<16x1xf32> -> vector<16x1xf32>
    %95 = vector.broadcast %94 : vector<16x1xf32> to vector<16x16xf32>
    %96 = arith.mulf %91, %95 : vector<16x16xf32>
    %97 = arith.truncf %96 : vector<16x16xf32> to vector<16x16xbf16>
    %cst_33 = arith.constant dense<0.000000e+00> : vector<16x32xf32>
    %98 = tpu.matmul %97, %85, %cst_33 {dimension_numbers = #tpu.dot_dimension_numbers<[1], [0], [0], [1], [0, 0, 1, 1], [], []>} : vector<16x16xbf16>, vector<16x32xbf16>, vector<16x32xf32> -> vector<16x32xf32>
    %99 = arith.truncf %98 : vector<16x32xf32> to vector<16x32xbf16>
    %c64 = arith.constant 64 : index
    %c0_34 = arith.constant 0 : index
    %100 = vector.load %arg3[%c64, %c0_34] : memref<128x128xbf16, #tpu.memory_space<vmem>>, vector<32x128xbf16>
    %cst_35 = arith.constant dense<0.000000e+00> : vector<16x128xf32>
    %101 = tpu.matmul %99, %100, %cst_35 {dimension_numbers = #tpu.dot_dimension_numbers<[1], [0], [0], [1], [0, 0, 1, 1], [], []>} : vector<16x32xbf16>, vector<32x128xbf16>, vector<16x128xf32> -> vector<16x128xf32>
    %102 = arith.addf %77, %101 : vector<16x128xf32>
    %103 = vector.extract_strided_slice %26 {offsets = [0, 96], sizes = [16, 32], strides = [1, 1]} : vector<16x384xf32> to vector<16x32xf32>
    %cst_36 = arith.constant 0.176776692 : f32
    %104 = vector.broadcast %cst_36 : f32 to vector<16x32xf32>
    %105 = arith.mulf %103, %104 : vector<16x32xf32>
    %106 = arith.truncf %105 : vector<16x32xf32> to vector<16x32xbf16>
    %107 = vector.extract_strided_slice %26 {offsets = [0, 224], sizes = [16, 32], strides = [1, 1]} : vector<16x384xf32> to vector<16x32xf32>
    %108 = arith.truncf %107 : vector<16x32xf32> to vector<16x32xbf16>
    %109 = vector.extract_strided_slice %26 {offsets = [0, 352], sizes = [16, 32], strides = [1, 1]} : vector<16x384xf32> to vector<16x32xf32>
    %110 = arith.truncf %109 : vector<16x32xf32> to vector<16x32xbf16>
    %cst_37 = arith.constant dense<0.000000e+00> : vector<16x16xf32>
    %111 = tpu.matmul %106, %108, %cst_37 {dimension_numbers = #tpu.dot_dimension_numbers<[1], [1], [0], [0], [0, 0, 1, 0], [], []>} : vector<16x32xbf16>, vector<16x32xbf16>, vector<16x16xf32> -> vector<16x16xf32>
    %cst_38 = arith.constant dense<0xFF800000> : vector<16xf32>
    %112 = vector.multi_reduction <maximumf>, %111, %cst_38 [1] : vector<16x16xf32> to vector<16xf32>
    %113 = vector.shape_cast %112 : vector<16xf32> to vector<16x1xf32>
    %114 = vector.broadcast %113 : vector<16x1xf32> to vector<16x16xf32>
    %115 = arith.subf %111, %114 : vector<16x16xf32>
    %116 = math.exp %115 : vector<16x16xf32>
    %cst_39 = arith.constant dense<0.000000e+00> : vector<16xf32>
    %117 = vector.multi_reduction <add>, %116, %cst_39 [1] : vector<16x16xf32> to vector<16xf32>
    %118 = vector.shape_cast %117 : vector<16xf32> to vector<16x1xf32>
    %119 = tpu.reciprocal %118 {approx = true} : vector<16x1xf32> -> vector<16x1xf32>
    %120 = vector.broadcast %119 : vector<16x1xf32> to vector<16x16xf32>
    %121 = arith.mulf %116, %120 : vector<16x16xf32>
    %122 = arith.truncf %121 : vector<16x16xf32> to vector<16x16xbf16>
    %cst_40 = arith.constant dense<0.000000e+00> : vector<16x32xf32>
    %123 = tpu.matmul %122, %110, %cst_40 {dimension_numbers = #tpu.dot_dimension_numbers<[1], [0], [0], [1], [0, 0, 1, 1], [], []>} : vector<16x16xbf16>, vector<16x32xbf16>, vector<16x32xf32> -> vector<16x32xf32>
    %124 = arith.truncf %123 : vector<16x32xf32> to vector<16x32xbf16>
    %c96 = arith.constant 96 : index
    %c0_41 = arith.constant 0 : index
    %125 = vector.load %arg3[%c96, %c0_41] : memref<128x128xbf16, #tpu.memory_space<vmem>>, vector<32x128xbf16>
    %cst_42 = arith.constant dense<0.000000e+00> : vector<16x128xf32>
    %126 = tpu.matmul %124, %125, %cst_42 {dimension_numbers = #tpu.dot_dimension_numbers<[1], [0], [0], [1], [0, 0, 1, 1], [], []>} : vector<16x32xbf16>, vector<32x128xbf16>, vector<16x128xf32> -> vector<16x128xf32>
    %127 = arith.addf %102, %126 : vector<16x128xf32>
    %128 = arith.addf %1, %127 : vector<16x128xf32>
    %c0_43 = arith.constant 0 : index
    %c0_44 = arith.constant 0 : index
    %129 = vector.load %arg10[%c0_43, %c0_44] : memref<1x128xf32, #tpu.memory_space<vmem>>, vector<1x128xf32>
    %130 = vector.broadcast %129 : vector<1x128xf32> to vector<16x128xf32>
    %131 = arith.addf %128, %130 : vector<16x128xf32>
    %c0_45 = arith.constant 0 : index
    %c0_46 = arith.constant 0 : index
    %132 = vector.load %arg8[%c0_45, %c0_46] : memref<1x128xf32, #tpu.memory_space<vmem>>, vector<1x128xf32>
    %c0_47 = arith.constant 0 : index
    %c0_48 = arith.constant 0 : index
    %133 = vector.load %arg9[%c0_47, %c0_48] : memref<1x128xf32, #tpu.memory_space<vmem>>, vector<1x128xf32>
    %cst_49 = arith.constant dense<0.000000e+00> : vector<16xf32>
    %134 = vector.multi_reduction <add>, %131, %cst_49 [1] : vector<16x128xf32> to vector<16xf32>
    %135 = vector.shape_cast %134 : vector<16xf32> to vector<16x1xf32>
    %cst_50 = arith.constant 1.280000e+02 : f32
    %136 = vector.broadcast %cst_50 : f32 to vector<16x1xf32>
    %137 = arith.divf %135, %136 : vector<16x1xf32>
    %138 = vector.broadcast %137 : vector<16x1xf32> to vector<16x128xf32>
    %139 = arith.subf %131, %138 : vector<16x128xf32>
    %140 = arith.mulf %139, %139 : vector<16x128xf32>
    %cst_51 = arith.constant dense<0.000000e+00> : vector<16xf32>
    %141 = vector.multi_reduction <add>, %140, %cst_51 [1] : vector<16x128xf32> to vector<16xf32>
    %142 = vector.shape_cast %141 : vector<16xf32> to vector<16x1xf32>
    %cst_52 = arith.constant 1.280000e+02 : f32
    %143 = vector.broadcast %cst_52 : f32 to vector<16x1xf32>
    %144 = arith.divf %142, %143 : vector<16x1xf32>
    %cst_53 = arith.constant 9.99999974E-6 : f32
    %145 = vector.broadcast %cst_53 : f32 to vector<16x1xf32>
    %146 = arith.addf %144, %145 : vector<16x1xf32>
    %147 = math.rsqrt %146 : vector<16x1xf32>
    %148 = vector.broadcast %147 : vector<16x1xf32> to vector<16x128xf32>
    %149 = arith.mulf %139, %148 : vector<16x128xf32>
    %150 = vector.broadcast %132 : vector<1x128xf32> to vector<16x128xf32>
    %151 = arith.mulf %149, %150 : vector<16x128xf32>
    %152 = vector.broadcast %133 : vector<1x128xf32> to vector<16x128xf32>
    %153 = arith.addf %151, %152 : vector<16x128xf32>
    %154 = arith.truncf %153 : vector<16x128xf32> to vector<16x128xbf16>
    %c0_54 = arith.constant 0 : index
    %c0_55 = arith.constant 0 : index
    %155 = vector.load %arg4[%c0_54, %c0_55] : memref<128x512xbf16, #tpu.memory_space<vmem>>, vector<128x512xbf16>
    %cst_56 = arith.constant dense<0.000000e+00> : vector<16x512xf32>
    %156 = tpu.matmul %154, %155, %cst_56 {dimension_numbers = #tpu.dot_dimension_numbers<[1], [0], [0], [1], [0, 0, 1, 1], [], []>} : vector<16x128xbf16>, vector<128x512xbf16>, vector<16x512xf32> -> vector<16x512xf32>
    %c0_57 = arith.constant 0 : index
    %c0_58 = arith.constant 0 : index
    %157 = vector.load %arg11[%c0_57, %c0_58] : memref<1x512xf32, #tpu.memory_space<vmem>>, vector<1x512xf32>
    %158 = vector.broadcast %157 : vector<1x512xf32> to vector<16x512xf32>
    %159 = arith.addf %156, %158 : vector<16x512xf32>
    %cst_59 = arith.constant 5.000000e-01 : f32
    %160 = vector.broadcast %cst_59 : f32 to vector<16x512xf32>
    %161 = arith.mulf %160, %159 : vector<16x512xf32>
    %cst_60 = arith.constant 0.707106769 : f32
    %162 = vector.broadcast %cst_60 : f32 to vector<16x512xf32>
    %163 = arith.mulf %159, %162 : vector<16x512xf32>
    %164 = math.absf %163 : vector<16x512xf32>
    %cst_61 = arith.constant 0.327591091 : f32
    %165 = vector.broadcast %cst_61 : f32 to vector<16x512xf32>
    %166 = arith.mulf %165, %164 : vector<16x512xf32>
    %cst_62 = arith.constant 1.000000e+00 : f32
    %167 = vector.broadcast %cst_62 : f32 to vector<16x512xf32>
    %168 = arith.addf %167, %166 : vector<16x512xf32>
    %cst_63 = arith.constant 1.000000e+00 : f32
    %169 = vector.broadcast %cst_63 : f32 to vector<16x512xf32>
    %170 = arith.divf %169, %168 : vector<16x512xf32>
    %cst_64 = arith.constant 1.06140542 : f32
    %171 = vector.broadcast %cst_64 : f32 to vector<16x512xf32>
    %172 = arith.mulf %170, %171 : vector<16x512xf32>
    %cst_65 = arith.constant -1.45315206 : f32
    %173 = vector.broadcast %cst_65 : f32 to vector<16x512xf32>
    %174 = arith.addf %173, %172 : vector<16x512xf32>
    %175 = arith.mulf %170, %174 : vector<16x512xf32>
    %cst_66 = arith.constant 1.42141378 : f32
    %176 = vector.broadcast %cst_66 : f32 to vector<16x512xf32>
    %177 = arith.addf %176, %175 : vector<16x512xf32>
    %178 = arith.mulf %170, %177 : vector<16x512xf32>
    %cst_67 = arith.constant -0.284496725 : f32
    %179 = vector.broadcast %cst_67 : f32 to vector<16x512xf32>
    %180 = arith.addf %179, %178 : vector<16x512xf32>
    %181 = arith.mulf %170, %180 : vector<16x512xf32>
    %cst_68 = arith.constant 0.254829586 : f32
    %182 = vector.broadcast %cst_68 : f32 to vector<16x512xf32>
    %183 = arith.addf %182, %181 : vector<16x512xf32>
    %184 = arith.mulf %170, %183 : vector<16x512xf32>
    %cst_69 = arith.constant 0.000000e+00 : f32
    %185 = vector.broadcast %cst_69 : f32 to vector<16x512xf32>
    %186 = arith.subf %185, %164 : vector<16x512xf32>
    %187 = arith.mulf %186, %164 : vector<16x512xf32>
    %188 = math.exp %187 : vector<16x512xf32>
    %189 = arith.mulf %184, %188 : vector<16x512xf32>
    %cst_70 = arith.constant 1.000000e+00 : f32
    %190 = vector.broadcast %cst_70 : f32 to vector<16x512xf32>
    %191 = arith.subf %190, %189 : vector<16x512xf32>
    %cst_71 = arith.constant 0.000000e+00 : f32
    %192 = vector.broadcast %cst_71 : f32 to vector<16x512xf32>
    %193 = arith.cmpf oge, %163, %192 : vector<16x512xf32>
    %cst_72 = arith.constant 0.000000e+00 : f32
    %194 = vector.broadcast %cst_72 : f32 to vector<16x512xf32>
    %195 = arith.subf %194, %191 : vector<16x512xf32>
    %196 = arith.select %193, %191, %195 : vector<16x512xi1>, vector<16x512xf32>
    %cst_73 = arith.constant 1.000000e+00 : f32
    %197 = vector.broadcast %cst_73 : f32 to vector<16x512xf32>
    %198 = arith.addf %197, %196 : vector<16x512xf32>
    %199 = arith.mulf %161, %198 : vector<16x512xf32>
    %200 = arith.truncf %199 : vector<16x512xf32> to vector<16x512xbf16>
    %c0_74 = arith.constant 0 : index
    %c0_75 = arith.constant 0 : index
    %201 = vector.load %arg5[%c0_74, %c0_75] : memref<512x128xbf16, #tpu.memory_space<vmem>>, vector<512x128xbf16>
    %cst_76 = arith.constant dense<0.000000e+00> : vector<16x128xf32>
    %202 = tpu.matmul %200, %201, %cst_76 {dimension_numbers = #tpu.dot_dimension_numbers<[1], [0], [0], [1], [0, 0, 1, 1], [], []>} : vector<16x512xbf16>, vector<512x128xbf16>, vector<16x128xf32> -> vector<16x128xf32>
    %c0_77 = arith.constant 0 : index
    %c0_78 = arith.constant 0 : index
    %203 = vector.load %arg12[%c0_77, %c0_78] : memref<1x128xf32, #tpu.memory_space<vmem>>, vector<1x128xf32>
    %204 = vector.broadcast %203 : vector<1x128xf32> to vector<16x128xf32>
    %205 = arith.addf %202, %204 : vector<16x128xf32>
    %206 = arith.addf %131, %205 : vector<16x128xf32>
    %c0_79 = arith.constant 0 : index
    %c0_80 = arith.constant 0 : index
    %c0_81 = arith.constant 0 : index
    %207 = vector.load %arg13[%c0_79, %c0_80, %c0_81] : memref<1x16x128xf32, #tpu.memory_space<vmem>>, vector<1x16x128xf32>
    %208 = vector.shape_cast %207 : vector<1x16x128xf32> to vector<16x128xf32>
    %209 = vector.shape_cast %206 : vector<16x128xf32> to vector<1x16x128xf32>
    tpu.vector_store %arg13[%c0_79, %c0_80, %c0_81], %209 {strides = array<i32>} : memref<1x16x128xf32, #tpu.memory_space<vmem>>, vector<1x16x128xf32>,
    return
  }
  func.func @transform_0(%arg0: i32) -> (i32, i32, i32) {
    %c0_i32 = arith.constant 0 : i32
    %c0_i32_0 = arith.constant 0 : i32
    %c0_i32_1 = arith.constant 0 : i32
    return %arg0, %c0_i32, %c0_i32_0 : i32, i32, i32
  }
  func.func @transform_1(%arg0: i32) -> (i32, i32) {
    %c0_i32 = arith.constant 0 : i32
    %c0_i32_0 = arith.constant 0 : i32
    %c0_i32_1 = arith.constant 0 : i32
    return %c0_i32, %c0_i32_0 : i32, i32
  }
  func.func @transform_2(%arg0: i32) -> (i32, i32) {
    %c0_i32 = arith.constant 0 : i32
    %c0_i32_0 = arith.constant 0 : i32
    %c0_i32_1 = arith.constant 0 : i32
    return %c0_i32, %c0_i32_0 : i32, i32
  }
  func.func @transform_3(%arg0: i32) -> (i32, i32) {
    %c0_i32 = arith.constant 0 : i32
    %c0_i32_0 = arith.constant 0 : i32
    %c0_i32_1 = arith.constant 0 : i32
    return %c0_i32, %c0_i32_0 : i32, i32
  }
  func.func @transform_4(%arg0: i32) -> (i32, i32) {
    %c0_i32 = arith.constant 0 : i32
    %c0_i32_0 = arith.constant 0 : i32
    %c0_i32_1 = arith.constant 0 : i32
    return %c0_i32, %c0_i32_0 : i32, i32
  }
  func.func @transform_5(%arg0: i32) -> (i32, i32) {
    %c0_i32 = arith.constant 0 : i32
    %c0_i32_0 = arith.constant 0 : i32
    %c0_i32_1 = arith.constant 0 : i32
    return %c0_i32, %c0_i32_0 : i32, i32
  }
  func.func @transform_6(%arg0: i32) -> (i32, i32) {
    %c0_i32 = arith.constant 0 : i32
    %c0_i32_0 = arith.constant 0 : i32
    %c0_i32_1 = arith.constant 0 : i32
    return %c0_i32, %c0_i32_0 : i32, i32
  }
  func.func @transform_7(%arg0: i32) -> (i32, i32) {
    %c0_i32 = arith.constant 0 : i32
    %c0_i32_0 = arith.constant 0 : i32
    %c0_i32_1 = arith.constant 0 : i32
    return %c0_i32, %c0_i32_0 : i32, i32
  }
  func.func @transform_8(%arg0: i32) -> (i32, i32) {
    %c0_i32 = arith.constant 0 : i32
    %c0_i32_0 = arith.constant 0 : i32
    %c0_i32_1 = arith.constant 0 : i32
    return %c0_i32, %c0_i32_0 : i32, i32
  }
  func.func @transform_9(%arg0: i32) -> (i32, i32) {
    %c0_i32 = arith.constant 0 : i32
    %c0_i32_0 = arith.constant 0 : i32
    %c0_i32_1 = arith.constant 0 : i32
    return %c0_i32, %c0_i32_0 : i32, i32
  }
  func.func @transform_10(%arg0: i32) -> (i32, i32) {
    %c0_i32 = arith.constant 0 : i32
    %c0_i32_0 = arith.constant 0 : i32
    %c0_i32_1 = arith.constant 0 : i32
    return %c0_i32, %c0_i32_0 : i32, i32
  }
  func.func @transform_11(%arg0: i32) -> (i32, i32) {
    %c0_i32 = arith.constant 0 : i32
    %c0_i32_0 = arith.constant 0 : i32
    %c0_i32_1 = arith.constant 0 : i32
    return %c0_i32, %c0_i32_0 : i32, i32
  }
  func.func @transform_12(%arg0: i32) -> (i32, i32, i32) {
    %c0_i32 = arith.constant 0 : i32
    %c0_i32_0 = arith.constant 0 : i32
    %c0_i32_1 = arith.constant 0 : i32
    return %arg0, %c0_i32, %c0_i32_0 : i32, i32, i32
  }
}

</mosaic_0001>

<bundles_post_ra>
// kernel: tpu_custom_call.1
= control target key start
LH: loop header
LB: loop body
LE: loop exit
PB: predicated region body
PF: predicated region fallthrough
CT: control target
= control target key end

     0   :  { %s3992_s0 = inlined_call_operand.hbm [shape: f32[2,16,128], index: 0, kind: input, shape index: {}]   ;;  %s3993_s1 = inlined_call_operand.hbm [shape: bf16[128,384], index: 1, kind: input, shape index: {}]   ;;  %s3994_s2 = inlined_call_operand.hbm [shape: bf16[128,128], index: 2, kind: input, shape index: {}]   ;;  %s3995_s3 = inlined_call_operand.hbm [shape: bf16[128,512], index: 3, kind: input, shape index: {}]   ;;  %s3996_s4 = inlined_call_operand.hbm [shape: bf16[512,128], index: 4, kind: input, shape index: {}]   ;;  %s3997_s5 = inlined_call_operand.vmem [shape: f32[1,128], index: 5, kind: input, shape index: {}]   ;;  %s3998_s6 = inlined_call_operand.vmem [shape: f32[1,128], index: 6, kind: input, shape index: {}]   ;;  %s3999_s7 = inlined_call_operand.vmem [shape: f32[1,128], index: 7, kind: input, shape index: {}]   ;;  %s4000_s8 = inlined_call_operand.vmem [shape: f32[1,128], index: 8, kind: input, shape index: {}]   ;;  %s4001_s9 = inlined_call_operand.vmem [shape: f32[1,128], index: 9, kind: input, shape index: {}]   ;;  %s4002_s10 = inlined_call_operand.vmem [shape: f32[1,512], index: 10, kind: input, shape index: {}]   ;;  %s4003_s11 = inlined_call_operand.vmem [shape: f32[1,128], index: 11, kind: input, shape index: {}]   ;;  %s4004_s12 = inlined_call_operand.hbm [shape: f32[2,16,128], index: 12, kind: output, shape index: {}]  }
   0x1   :  { %4011 = sst [smem:[#allocation18_spill]] %s3993_s1 }
   0x2   :  { %4012 = sst [smem:[#allocation19_spill]] %s3994_s2 }
   0x3   :  { %4013 = sst [smem:[#allocation20_spill]] %s3995_s3 }
   0x4   :  { %4014 = sst [smem:[#allocation21_spill]] %s3996_s4 }
   0x5   :  { %17 = vsyncpa [#allocation3], 0 }
   0x6   :  { %19 = vsyncpa [#allocation3 + $0x1], 0 }
   0x7   :  { %20 = vsyncpa [#allocation6], 0 }
   0x8   :  { %21 = vsyncpa [#allocation9], 0 }
   0x9   :  { %22 = vsyncpa [#allocation4], 0 }
   0xa   :  { %24 = vsyncpa [#allocation4 + $0x1], 0  ;;  %s3468_s21 = smov 0   ;;  %s3470_s22 = smov 0  }
   0xb   :  { %s3472_s23 = smov 0   ;;  %s3474_s24 = smov 0  }
   0xc LB: > { %4015 = sst [smem:[#allocation16_spill]] %s3367_s21  ;;  %s3489_s25 = sadd.s32 4294967295, %s3379_s24   ;;  %s3379_s24 = sphi %s3474_s24, %s4042_s24   ;;  %s3375_s23 = sphi %s3472_s23, %s4041_s23   ;;  %s3371_s22 = sphi %s3470_s22, %s4040_s22   ;;  %s3367_s21 = sphi %s3468_s21, %s4039_s21  }
   0xd   : > { %s2560_s26 = sadd.s32 4294967294, %s3379_s24   ;;  %p50_p0 = scmp.ne.s32.totalorder %s3371_s22, %s3367_s21 }
   0xe   : > { %p4005_p1 = scmp.eq.s32.totalorder %s3489_s25, 0  ;;  %p311_p3 = scmp.eq.s32.totalorder %s2560_s26, 1 }
   0xf   : > { %p2561_p5 = scmp.ge.s32.totalorder %s3379_s24, 1  ;;  %p318_p7 = scmp.lt.s32.totalorder %s3379_s24, 3 }
  0x10   : > { %p3498_p4 = por %p4005_p1, %p50_p0  ;;  %p3503_p6 = por %p311_p3, %p50_p0 }
  0x11   : > { %p3508_p8 = pnand %p2561_p5, %p318_p7  ;;  %s3381_s30 = smov [#allocation5]  }
  0x12   : > { %s4016_s27 = scalar_select %p3498_p4, 1, 0 }
  0x13   : > { %s4017_s28 = scalar_select %p3503_p6, 1, 0 }
  0x14   : > { %s4019_s29 = scalar_select %p3508_p8, 1, 0 }
  0x15   : > { %4018 = sst [smem:[#allocation17_spill]] %s4017_s28  ;;  %s330_s13 = sshll.u32 %s3381_s30, 4  ;;  %s331_s13 = int_to_ptr.vmem [resolvable:$true] %s330_s13 }
  0x16   : > { %p2899_p9 = pneg %p3508_p8  ;;  %s3382_s15 = smov [#allocation8]  }
  0x17   : > { %s356_s16 = sshll.u32 %s3382_s15, 4  ;;  %s3186_s17 = scalar_lea.vmem %s331_s13, 3072  ;;  %s357_s16 = int_to_ptr.vmem [resolvable:$true] %s356_s16 }
  0x18   : > { %p3517_p11 = pnand %p2899_p9, %p4005_p1  ;;  %p3187_p13 = scmp.ne.s32.totalorder %s331_s13, %s3186_s17 }
  0x19   : > { %p3194_p5 = scmp.lt.s32.totalorder %s331_s13, %s331_s13  ;;  %p3195_p7 = scmp.lt.s32.totalorder %s3186_s17, %s3186_s17 }
  0x1a   : > { %p3177_p12 = pneg %p3517_p11 }
  0x1b   : > { %p3196_p10 = por %p3195_p7, %p3194_p5 }
  0x1c   : > { %p3189_p0 = pnand %p3187_p13, %p3177_p12 }
  0x1e   : > { %p3190_p3 = pneg %p3189_p0 }
  0x20   : > { %p3197_p9 = pnand %p3196_p10, %p3190_p3 }
  0x22   : > { %3200 = shalt.err (!%p3197_p9)
}
  0x23   : > { %s3383_s18 = smov 192   ;;  %s3384_s19 = smov 12  }
  0x24   : > { %s4021_s1 = sld [smem:[#allocation18_spill]]  ;;  %s3212_s30 = scalar_lea.vmem %s357_s16, 4096 }
  0x25   : > { %p3213_p1 = scmp.ne.s32.totalorder %s357_s16, %s3212_s30  ;;  %p3220_p2 = scmp.lt.s32.totalorder %s357_s16, %s357_s16 }
  0x26   : > { %p3221_p6 = scmp.lt.s32.totalorder %s3212_s30, %s3212_s30 }
  0x27   : > { %p3215_p13 = pnand %p3213_p1, %p3177_p12 }
  0x28   : > { %p3222_p5 = por %p3221_p6, %p3220_p2 }
  0x29   : > { %p3216_p0 = pneg %p3215_p13 }
  0x2a   : > { %2902 = dma.hbm_to_vmem [thread:$0]  (!%p3517_p11), %s4021_s1, 3072, %s331_s13, [#allocation6], %s3383_s18, %s3383_s18, %s3384_s19  }
  0x2b   : > { %p3223_p10 = pnand %p3222_p5, %p3216_p0 }
  0x2d   : > { %3226 = shalt.err (!%p3223_p10)
}
  0x2e   : > { %s3385_s15 = smov 256   ;;  %s3386_s17 = smov 16  }
  0x2f   : > { %s4022_s3 = sld [smem:[#allocation20_spill]]  ;;  %s3387_s13 = smov [#allocation7]  }
  0x30   : > { %s343_s18 = sshll.u32 %s3387_s13, 4  ;;  %s344_s18 = int_to_ptr.vmem [resolvable:$true] %s343_s18 }
  0x31   : > { %s3238_s19 = scalar_lea.vmem %s344_s18, 1024  ;;  %p3246_p6 = scmp.lt.s32.totalorder %s344_s18, %s344_s18 }
  0x32   : > { %p3239_p1 = scmp.ne.s32.totalorder %s344_s18, %s3238_s19  ;;  %p3247_p7 = scmp.lt.s32.totalorder %s3238_s19, %s3238_s19 }
  0x34   : > { %p3241_p3 = pnand %p3239_p1, %p3177_p12  ;;  %p3248_p9 = por %p3247_p7, %p3246_p6 }
  0x35   : > { %2908 = dma.hbm_to_vmem [thread:$0]  (!%p3517_p11), %s4022_s3, 4096, %s357_s16, [#allocation9], %s3385_s15, %s3385_s15, %s3386_s17  }
  0x36   : > { %p3242_p2 = pneg %p3241_p3 }
  0x38   : > { %p3249_p13 = pnand %p3248_p9, %p3242_p2 }
  0x3a   : > { %3252 = shalt.err (!%p3249_p13)
}
  0x3b   : > { %s3388_s20 = smov 64   ;;  %s3389_s26 = smov 4  }
  0x3c   : > { %s4023_s2 = sld [smem:[#allocation19_spill]]  ;;  %s3390_s16 = smov [#allocation10]  }
  0x3d   : > { %s369_s30 = sshll.u32 %s3390_s16, 4  ;;  %s370_s30 = int_to_ptr.vmem [resolvable:$true] %s369_s30 }
  0x3e   : > { %s3264_s15 = scalar_lea.vmem %s370_s30, 4096  ;;  %p3272_p1 = scmp.lt.s32.totalorder %s370_s30, %s370_s30 }
  0x3f   : > { %p3265_p0 = scmp.ne.s32.totalorder %s370_s30, %s3264_s15  ;;  %p3273_p3 = scmp.lt.s32.totalorder %s3264_s15, %s3264_s15 }
  0x41   : > { %p3267_p5 = pnand %p3265_p0, %p3177_p12  ;;  %p3274_p2 = por %p3273_p3, %p3272_p1 }
  0x42   : > { %2905 = dma.hbm_to_vmem [thread:$0]  (!%p3517_p11), %s4023_s2, 1024, %s344_s18, [#allocation6], %s3388_s20, %s3388_s20, %s3389_s26  }
  0x43   : > { %p3268_p10 = pneg %p3267_p5 }
  0x45   : > { %p3275_p6 = pnand %p3274_p2, %p3268_p10 }
  0x47   : > { %3278 = shalt.err (!%p3275_p6)
}
  0x48   : > { %s4024_s4 = sld [smem:[#allocation21_spill]]  ;;  %s3556_s18 = sadd.s32 1, %s3379_s24  }
  0x49   : > { %s37_s19 = sadd.s32 1, %s3375_s23  ;;  %s34_s14 = ssub.s32 %s3379_s24, %s3556_s18 }
  0x4a   : > { %p44_p12 = scmp.ne.s32.totalorder %s3375_s23, %s3371_s22  ;;  %p35_p7 = scmp.eq.s32.totalorder %s34_s14, 0 }
  0x4b   : > { %p45_p9 = scmp.eq.s32.totalorder %s3379_s24, 0  ;;  %p4025_p13 = scmp.eq.s32.totalorder %s3489_s25, 1 }
  0x4c   : > { %p2924_p5 = scmp.lt.s32.totalorder %s3379_s24, 2  ;;  %s404_s16 = sand.u32 1, %s3375_s23  }
  0x4d   : > { %p3566_p0 = por %p4025_p13, %p44_p12  ;;  %p46_p10 = por %p45_p9, %p44_p12 }
  0x4e   : > { %2911 = dma.hbm_to_vmem [thread:$0]  (!%p3517_p11), %s4024_s4, 4096, %s370_s30, [#allocation9], %s3388_s20, %s3388_s20, %s3389_s26  }
  0x4f   : > { %s4026_s21 = scalar_select %p3566_p0, 1, 0 }
  0x50   : > { %s3572_s28 = scalar_select %p35_p7, %s3375_s23, %s37_s19  }
  0x51   : > { %s2567_s15 = sshll.u32 %s404_s16, 4  ;;  %s2696_s20 = sshll.u32 %s3379_s24, 8 }
  0x52   : > { %s3579_s17 = scalar_lea.hbm %s3992_s0, %s2696_s20  ;;  %s408_s13 = scalar_lea.vmem [#allocation2], %s2567_s15 }
  0x53   : > { %s415_s14 = sshll.u32 %s408_s13, 4  ;;  %p3583_p11 = pnand %p2924_p5, %p46_p10  ;;  %s3581_s14 = int_to_ptr.vmem [resolvable:$true] %s415_s14 }
  0x54   : > { %s3587_s19 = scalar_lea.sflag [#allocation3], %s404_s16  ;;  %s3279_s2 = scalar_lea.hbm %s3579_s17, 256 }
  0x55   : > { %p3280_p1 = scmp.ne.s32.totalorder %s3579_s17, %s3279_s2  ;;  %p3281_p3 = pneg %p3583_p11 }
  0x56   : > { %s3284_s15 = scalar_lea.hbm %s3992_s0, 512  ;;  %p3285_p12 = scmp.lt.s32.totalorder %s3579_s17, %s3992_s0 }
  0x57   : > { %p3282_p2 = pnand %p3281_p3, %p3280_p1  ;;  %p3286_p7 = scmp.lt.s32.totalorder %s3284_s15, %s3279_s2 }
  0x59   : > { %p3283_p6 = pneg %p3282_p2  ;;  %p3287_p9 = por %p3286_p7, %p3285_p12 }
  0x5b   : > { %p3288_p13 = pnand %p3287_p9, %p3283_p6 }
  0x5d   : > { %3291 = shalt.err (!%p3288_p13)
}
  0x5e   : > { %s3292_s16 = scalar_lea.vmem %s3581_s14, 256  ;;  %s3391_s3 = smov [#allocation2]  }
  0x5f   : > { %p3293_p5 = scmp.ne.s32.totalorder %s3581_s14, %s3292_s16  ;;  %s3297_s4 = sshll.u32 %s3391_s3, 4  ;;  %s3298_s4 = int_to_ptr.vmem [resolvable:$false] %s3297_s4 }
  0x60   : > { %s3299_s20 = scalar_lea.vmem %s3298_s4, 512  ;;  %p3300_p2 = scmp.lt.s32.totalorder %s3581_s14, %s3298_s4 }
  0x61   : > { %p3295_p10 = pnand %p3293_p5, %p3281_p3  ;;  %p3301_p0 = scmp.lt.s32.totalorder %s3299_s20, %s3292_s16 }
  0x63   : > { %p3296_p1 = pneg %p3295_p10  ;;  %p3302_p4 = por %p3301_p0, %p3300_p2 }
  0x65   : > { %p3303_p8 = pnand %p3302_p4, %p3296_p1 }
  0x67   : > { %3306 = shalt.err (!%p3303_p8)
}
  0x68   : > { %s3392_s2 = smov 128   ;;  %s3393_s26 = smov 8  }
  0x69   : > { %2915 = dma.hbm_to_vmem [thread:$0]  (!%p3583_p11), %s3579_s17, 256, %s3581_s14, %s3587_s19, %s3392_s2, %s3392_s2, %s3393_s26  }
  0x6a   : > { %p4028_p3 = scmp.ne.s32.totalorder %s4019_s29, 0 }
  0x6b   : > { %s3611_s3 = sand.u32 (!%p4028_p3), 1, %s3371_s22   ;;  %p4029_p4 = scmp.ne.s32.totalorder (!%p4028_p3), %s4016_s27, 0 }
  0x6c   : > { %427 = sbr.rel (%p4028_p3) target bundleno = 3697 (0xe71), region = 68  ;;  %s2571_s4 = sshll.u32 (!%p4028_p3), %s3611_s3, 4 }
  0x6d   : > { %s430_s15 = scalar_lea.sflag (!%p4028_p3), [#allocation3], %s3611_s3  ;;  %s3617_s30 = scalar_lea.vmem (!%p4028_p3), [#allocation2], %s2571_s4 }
  0x71   : > { %3350 = dma.done.wait (%p4029_p4), %s430_s15, 256  }
  0x72   : > { %3352 = vsyncadd (%p4029_p4), %s430_s15, 4294967040  ;;  %p4030_p8 = scmp.eq.s32.totalorder %s3489_s25, 0 }
  0x74   : > { %3354 = dma.done.wait (%p4030_p8), [#allocation6], 4096   ;;  %p4031_p0 = pmov %p4030_p8 }
  0x76   : > { %3356 = vsyncadd (%p4031_p0), [#allocation6], 4294963200  ;;  %p4032_p11 = pmov %p4031_p0 }
  0x77   : > { %p4033_p6 = pmov %p4031_p0 }
  0x78   : > { %3358 = dma.done.wait (%p4032_p11), [#allocation9], 8192  }
  0x79   : > { %3360 = vsyncadd (%p4033_p6), [#allocation9], 4294959104  ;;  %v3632_v0 = vld [vmem:[%s3617_s30] sm:$0xff]  ;;  %v492_v1 = vld [vmem:[%s3617_s30 + $0x8] sm:$0xff]  ;;  %v3394_v4 = vmov 0.0   ;;  %v3395_v27 = vmov 0  }
  0x7a   : > { %495 = vadd.xlane.f32.xlu0 %v3632_v0  ;;  %v2982_v2 = vld [vmem:[#allocation5 + $0xac] ss:$12 sps:$4 sm:$0xff]   ;;  %v2984_v3 = vld [vmem:[#allocation5 + $0xa8] ss:$12 sps:$4 sm:$0xff]   ;;  %2779 = vmatprep.subr.bf16.mxu1 %v3394_v4  ;;  %v2985_v5 = vld [vmem:[#allocation5 + $0xb0] ss:$12 sps:$4 sm:$0xff]  }
  0x7b   : > { %695 = vmatprep.subr.bf16.mxu0 %v2982_v2  ;;  %2780 = vmatpush3.bf16.msra.mxu1 %v2985_v5  ;;  %v2986_v14 = vld [vmem:[#allocation5 + $0x94] ss:$12 sps:$4 sm:$0xff]   ;;  %v2988_v15 = vld [vmem:[#allocation5 + $0x90] ss:$12 sps:$4 sm:$0xff]   ;;  %v2989_v16 = vld [vmem:[#allocation5 + $0x98] ss:$12 sps:$4 sm:$0xff]  }
  0x7c   : > { %696 = vmatpush1.bf16.msra.mxu0 %v2984_v3  ;;  %2781 = vmatprep.subr.bf16.mxu1 %v3394_v4  ;;  %v2990_v17 = vld [vmem:[#allocation5 + $0x7c] ss:$12 sps:$4 sm:$0xff]   ;;  %v2992_v18 = vld [vmem:[#allocation5 + $0x78] ss:$12 sps:$4 sm:$0xff]   ;;  %v2993_v19 = vld [vmem:[#allocation5 + $0x80] ss:$12 sps:$4 sm:$0xff]  }
  0x7d   : > { %697 = vmatprep.subr.bf16.mxu0 %v2986_v14  ;;  %v2994_v20 = vld [vmem:[#allocation5 + $0x64] ss:$12 sps:$4 sm:$0xff]   ;;  %v2996_v21 = vld [vmem:[#allocation5 + $0x60] ss:$12 sps:$4 sm:$0xff]   ;;  %v2997_v22 = vld [vmem:[#allocation5 + $0x68] ss:$12 sps:$4 sm:$0xff]   ;;  %727 = vmatprep.mubr.bf16.mxu0 %v3395_v27 }
  0x7e   : > { %497 = vadd.xlane.f32.xlu0 %v492_v1  ;;  %v2998_v23 = vld [vmem:[#allocation5 + $0x4c] ss:$12 sps:$4 sm:$0xff]   ;;  %v3000_v24 = vld [vmem:[#allocation5 + $0x48] ss:$12 sps:$4 sm:$0xff]   ;;  %v3001_v25 = vld [vmem:[#allocation5 + $0x50] ss:$12 sps:$4 sm:$0xff]  }
  0x7f   : > { %2782 = vmatpush3.bf16.msra.mxu1 %v2989_v16  ;;  %v3002_v26 = vld [vmem:[#allocation5 + $0x34] ss:$12 sps:$4 sm:$0xff]   ;;  %vm3396_vm0 = vmmov 0   ;;  %v3004_v28 = vld [vmem:[#allocation5 + $0x30] ss:$12 sps:$4 sm:$0xff]   ;;  %vm784_vm1 = vcmask 261120  }
  0x80   : > { %698 = vmatpush1.bf16.msra.mxu0 %v2988_v15  ;;  %2783 = vmatprep.subr.bf16.mxu1 %v3394_v4  ;;  %v3005_v29 = vld [vmem:[#allocation5 + $0x38] ss:$12 sps:$4 sm:$0xff]   ;;  %v3006_v30 = vld [vmem:[#allocation5 + $0x1c] ss:$12 sps:$4 sm:$0xff]   ;;  %v3009_v32 = vld [vmem:[#allocation5 + $0x20] ss:$12 sps:$4 sm:$0xff]  }
  0x81   : > { %699 = vmatprep.subr.bf16.mxu0 %v2990_v17  ;;  %2795 = vmatprep.mubr.msk.bf16.mxu1 %vm3396_vm0, %v3394_v4  ;;  %v3008_v31 = vld [vmem:[#allocation5 + $0x18] ss:$12 sps:$4 sm:$0xff]   ;;  %v3012_v34 = vld [vmem:[#allocation5] ss:$12 sps:$4 sm:$0xff]   ;;  %v3013_v35 = vld [vmem:[#allocation5 + $0x8] ss:$12 sps:$4 sm:$0xff]  }
  0x82   : > { %v3010_v33 = vld [vmem:[#allocation5 + $0x4] ss:$12 sps:$4 sm:$0xff]   ;;  %v2577_v44 = vld [vmem:[%s3997_s5] ss:$0 sm:$0xff]  ;;  %s3397_s14 = smov 96   ;;  %vm832_vm2 = vcmask 130048  }
  0x83   : > { %2784 = vmatpush3.bf16.msra.mxu1 %v2993_v19  ;;  %v2578_v48 = vld [vmem:[%s3998_s6] ss:$0 sm:$0xff]  ;;  %s3398_s19 = smov 64   ;;  %s3399_s13 = smov 32  }
  0x84   : > { %700 = vmatpush1.bf16.msra.mxu0 %v2992_v18  ;;  %2785 = vmatprep.subr.bf16.mxu1 %v3394_v4  ;;  %p4034_p7 = scmp.ne.s32.totalorder %s4026_s21, 0 }
  0x85   : > { %701 = vmatprep.subr.bf16.mxu0 %v2994_v20 }
  0x87   : > { %2786 = vmatpush3.bf16.msra.mxu1 %v2997_v22 }
  0x88   : > { %702 = vmatpush1.bf16.msra.mxu0 %v2996_v21  ;;  %2787 = vmatprep.subr.bf16.mxu1 %v3394_v4 }
  0x89   : > { %703 = vmatprep.subr.bf16.mxu0 %v2998_v23 }
  0x8b   : > { %2788 = vmatpush3.bf16.msra.mxu1 %v3001_v25 }
  0x8c   : > { %704 = vmatpush1.bf16.msra.mxu0 %v3000_v24  ;;  %2789 = vmatprep.subr.bf16.mxu1 %v3394_v4 }
  0x8d   : > { %705 = vmatprep.subr.bf16.mxu0 %v3002_v26 }
  0x8f   : > { %2790 = vmatpush3.bf16.msra.mxu1 %v3005_v29 }
  0x90   : > { %706 = vmatpush1.bf16.msra.mxu0 %v3004_v28  ;;  %2791 = vmatprep.subr.bf16.mxu1 %v3394_v4 }
  0x91   : > { %707 = vmatprep.subr.bf16.mxu0 %v3006_v30 }
  0x93   : > { %2792 = vmatpush3.bf16.msra.mxu1 %v3009_v32 }
  0x94   : > { %708 = vmatpush1.bf16.msra.mxu0 %v3008_v31  ;;  %2793 = vmatprep.subr.bf16.mxu1 %v3394_v4 }
  0x95   : > { %709 = vmatprep.subr.bf16.mxu0 %v3010_v33 }
  0x97   : > { %2794 = vmatpush3.bf16.msra.mxu1 %v3013_v35 }
  0x98   : > { %710 = vmatpush1.bf16.msra.mxu0 %v3012_v34  ;;  %2805 = vmatprep.subr.bf16.mxu1 %v3394_v4 }
  0x99   : > { %2799 = vmatprep.subr.bf16.mxu0 %v3394_v4 }
 0x103   : > { %v496_v6 = vpop.xlane.xlu0 %495 }
 0x104   : > { %v500_v7 = vmul.f32 0.0078125, %v496_v6 }
 0x106   : > { %v3639_v8 = vsub.f32 %v3632_v0, %v500_v7 }
 0x107   : > { %v498_v9 = vpop.xlane.xlu0 %497 }
 0x108   : > { %v501_v10 = vmul.f32 0.0078125, %v498_v9  ;;  %v504_v11 = vmul.f32 %v3639_v8, %v3639_v8 }
 0x10a   : > { %v3643_v12 = vsub.f32 %v492_v1, %v501_v10  ;;  %506 = vadd.xlane.f32.xlu1 %v504_v11 }
 0x10c   : > { %v505_v13 = vmul.f32 %v3643_v12, %v3643_v12 }
 0x10e   : > { %508 = vadd.xlane.f32.xlu1 %v505_v13 }
 0x193   : > { %v507_v36 = vpop.xlane.xlu1 %506 }
 0x194   : > { %v510_v37 = vmul.f32 0.0078125, %v507_v36 }
 0x196   : > { %v512_v38 = vadd.f32 1e-05, %v510_v37 }
 0x197   : > { %v509_v39 = vpop.xlane.xlu1 %508 }
 0x198   : > { %3102 = vrsqrt.f32 %v512_v38  ;;  %v511_v40 = vmul.f32 0.0078125, %v509_v39 }
 0x19a   : > { %v513_v41 = vadd.f32 1e-05, %v511_v40 }
 0x19c   : > { %3104 = vrsqrt.f32 %v513_v41 }
 0x1a5   : > { %v3103_v42 = vpop.eup %3102 }
 0x1a6   : > { %v516_v43 = vmul.f32 %v3103_v42, %v3639_v8 }
 0x1a8   : > { %v524_v47 = vmul.f32 %v2577_v44, %v516_v43 }
 0x1a9   : > { %v3105_v45 = vpop.eup %3104 }
 0x1aa   : > { %v517_v46 = vmul.f32 %v3105_v45, %v3643_v12  ;;  %v532_v50 = vadd.f32 %v2578_v48, %v524_v47 }
 0x1ac   : > { %v525_v49 = vmul.f32 %v2577_v44, %v517_v46 }
 0x1ae   : > { %v533_v51 = vadd.f32 %v2578_v48, %v525_v49  ;;  %v3016_v48 = vld [vmem:[#allocation7 + $0x18] sm:$0xff]  }
 0x1b0   : > { %v534_v52 = vpack.c.bf16 %v533_v51, %v532_v50 }
 0x1b2   : > { %728 = vmatmul.mubr.bf16.vlgmr.msra.gmra.mxu0 %v534_v52  ;;  %2796 = vmatmul.mubr.bf16.vlgmr.msra.gmra.mxu1 %v534_v52 }
 0x1b3   : > { %2801 = vmatprep.mubr.msk.bf16.mxu0 %vm3396_vm0, %v3394_v4  ;;  %2807 = vmatprep.mubr.msk.bf16.mxu1 %vm3396_vm0, %v3394_v4 }
 0x272   : > { %v729_v53 = vpop.f32.mrf.mxu0  ;;  %v772_v54 = vpop.f32.mrf.mxu1 }
 0x273   : > { %v779_v59 = vmul.f32 0.17677669, %v729_v53 }
 0x274   : > { %v731_v55 = vpop.f32.mrf.mxu0  ;;  %v2797_v56 = vpop.f32.mrf.mxu1 }
 0x275   : > { %v3014_v56 = vld [vmem:[#allocation7 + $0x8] sm:$0xff]  }
 0x276   : > { %v733_v57 = vpop.f32.mrf.mxu0  ;;  %v775_v58 = vpop.f32.mrf.mxu1 }
 0x277   : > { %v780_v60 = vmul.f32 0.17677669, %v733_v57  ;;  %v3670_v61 = vpack.c.bf16 %v775_v58, %v772_v54  ;;  %v3015_v58 = vld [vmem:[#allocation7] sm:$0xff]  }
 0x278   : > { %v735_v62 = vpop.f32.mrf.mxu0  ;;  %v2798_v63 = vpop.f32.mrf.mxu1 }
 0x279   : > { %v3672_v1 = vpack.c.bf16 %v780_v60, %v779_v59  ;;  %v3674_v2 = vpack.c.bf16 %v735_v62, %v731_v55  ;;  %2806 = vmatpush3.bf16.msra.mxu1 %v3670_v61  ;;  %v3017_v59 = vld [vmem:[#allocation7 + $0x10] sm:$0xff]  }
 0x27a   : > { %2817 = vmatprep.subr.bf16.mxu1 %v3394_v4 }
 0x27b   : > { %906 = vrot.lane.b32.xlu1 %v3672_v1, %s3397_s14  ;;  %909 = vrot.lane.b32.xlu0 %v3674_v2, %s3397_s14  ;;  %v789_v3 = vsel %vm784_vm1, %v3674_v2, 0 }
 0x27c   : > { %2800 = vmatpush3.bf16.xpose.msra.mxu0 %v789_v3 }
 0x27d   : > { %2811 = vmatprep.subr.bf16.mxu0 %v3394_v4 }
 0x283   : > { %2802 = vmatmul.mubr.msk.bf16.vlgmr.msra.gmra.mxu0 %vm784_vm1, %v3672_v1 }
 0x284   : > { %2813 = vmatprep.mubr.msk.bf16.mxu0 %vm3396_vm0, %v3394_v4 }
 0x2ed   : > { %v910_v5 = vpop.permute.xlu0 %909  ;;  %v907_v7 = vpop.permute.xlu1 %906 }
 0x2ee   : > { %v915_v6 = vsel %vm784_vm1, %v910_v5, 0 }
 0x2ef   : > { %2812 = vmatpush3.bf16.xpose.msra.mxu0 %v915_v6 }
 0x2f0   : > { %2823 = vmatprep.subr.bf16.mxu0 %v3394_v4 }
 0x2f6   : > { %2814 = vmatmul.mubr.msk.bf16.vlgmr.msra.gmra.mxu0 %vm784_vm1, %v907_v7 }
 0x2f7   : > { %2827 = vmatprep.mubr.msk.bf16.mxu0 %vm3396_vm0, %v3394_v4  ;;  %2824 = vmatpush3.bf16.msra.mxu0 %v3016_v48  ;;  %v3018_v48 = vld [vmem:[#allocation7 + $0x28] sm:$0xff]  }
 0x2f8   : > { %2825 = vmatprep.subr.bf16.mxu0 %v3394_v4 }
 0x2fb   : > { %2826 = vmatpush3.bf16.msra.mxu0 %v3017_v59 }
 0x2fc   : > { %2839 = vmatprep.subr.bf16.mxu0 %v3394_v4 }
 0x343   : > { %v825_v8 = vpop.f32.mrf.mxu0 }
 0x344   : > { %v833_v9 = vsel %vm832_vm2, %v825_v8, -inf }
 0x345   : > { %834 = vmax.xlane.f32.xlu1 %v833_v9  ;;  %v2803_v10 = vpop.f32.mrf.mxu0 }
 0x347   : > { %v828_v11 = vpop.f32.mrf.mxu0 }
 0x348   : > { %v836_v12 = vsel %vm832_vm2, %v828_v11, -inf }
 0x349   : > { %837 = vmax.xlane.f32.xlu0 %v836_v12  ;;  %v2804_v13 = vpop.f32.mrf.mxu0 }
 0x3b6   : > { %v951_v14 = vpop.f32.mrf.mxu0 }
 0x3b7   : > { %v958_v15 = vsel %vm832_vm2, %v951_v14, -inf }
 0x3b8   : > { %959 = vmax.xlane.f32.xlu0 %v958_v15  ;;  %v2815_v16 = vpop.f32.mrf.mxu0 }
 0x3ba   : > { %v954_v17 = vpop.f32.mrf.mxu0 }
 0x3bb   : > { %v961_v18 = vsel %vm832_vm2, %v954_v17, -inf }
 0x3bc   : > { %962 = vmax.xlane.f32.xlu1 %v961_v18  ;;  %v2816_v19 = vpop.f32.mrf.mxu0 }
 0x3ce   : > { %v835_v20 = vpop.xlane.xlu1 %834 }
 0x3cf   : > { %v839_v21 = vsub.f32 %v825_v8, %v835_v20 }
 0x3d1   : > { %v841_v22 = vmul.f32 1.442695, %v839_v21 }
 0x3d2   : > { %v838_v23 = vpop.xlane.xlu0 %837 }
 0x3d3   : > { %3106 = vpow2.f32 %v841_v22  ;;  %v840_v24 = vsub.f32 %v828_v11, %v838_v23 }
 0x3d5   : > { %v843_v25 = vmul.f32 1.442695, %v840_v24 }
 0x3d7   : > { %3108 = vpow2.f32 %v843_v25 }
 0x3e0   : > { %v3107_v26 = vpop.eup %3106 }
 0x3e1   : > { %v845_v28 = vsel %vm832_vm2, %v3107_v26, 0.0 }
 0x3e2   : > { %846 = vadd.xlane.f32.xlu0 %v845_v28 }
 0x3e4   : > { %v3109_v29 = vpop.eup %3108 }
 0x3e5   : > { %v848_v30 = vsel %vm832_vm2, %v3109_v29, 0.0 }
 0x3e6   : > { %849 = vadd.xlane.f32.xlu1 %v848_v30 }
 0x441   : > { %v960_v31 = vpop.xlane.xlu0 %959 }
 0x442   : > { %v964_v32 = vsub.f32 %v951_v14, %v960_v31 }
 0x444   : > { %v966_v33 = vmul.f32 1.442695, %v964_v32 }
 0x445   : > { %v963_v34 = vpop.xlane.xlu1 %962 }
 0x446   : > { %3110 = vpow2.f32 %v966_v33  ;;  %v965_v35 = vsub.f32 %v954_v17, %v963_v34 }
 0x448   : > { %v968_v36 = vmul.f32 1.442695, %v965_v35 }
 0x44a   : > { %3112 = vpow2.f32 %v968_v36 }
 0x453   : > { %v3111_v37 = vpop.eup %3110 }
 0x454   : > { %v970_v38 = vsel %vm832_vm2, %v3111_v37, 0.0 }
 0x455   : > { %971 = vadd.xlane.f32.xlu0 %v970_v38 }
 0x457   : > { %v3113_v39 = vpop.eup %3112 }
 0x458   : > { %v973_v40 = vsel %vm832_vm2, %v3113_v39, 0.0 }
 0x459   : > { %974 = vadd.xlane.f32.xlu1 %v973_v40 }
 0x46a   : > { %1148 = vrot.lane.b32.xlu1 %v3674_v2, %s3398_s19 }
 0x46b   : > { %982 = vrot.lane.b32.xlu0 %v3670_v61, %s3397_s14  ;;  %v847_v41 = vpop.xlane.xlu0 %846  ;;  %s489_s14 = scalar_lea.vmem [#allocation11], %s2571_s4  ;;  %s2436_s4 = scalar_lea.sflag [#allocation4], %s3611_s3 }
 0x46c   : > { %3114 = vrcp.f32 %v847_v41 }
 0x46e   : > { %1146 = vrot.lane.b32.xlu1 %v3672_v1, %s3398_s19 }
 0x46f   : > { %v850_v42 = vpop.xlane.xlu1 %849 }
 0x470   : > { %3116 = vrcp.f32 %v850_v42 }
 0x479   : > { %v3115_v43 = vpop.eup %3114 }
 0x47a   : > { %v853_v45 = vmul.f32 %v3115_v43, %v3107_v26 }
 0x47d   : > { %v3117_v44 = vpop.eup %3116 }
 0x47e   : > { %v854_v46 = vmul.f32 %v3117_v44, %v3109_v29 }
 0x480   : > { %v855_v47 = vpack.c.bf16 %v854_v46, %v853_v45 }
 0x482   : > { %2808 = vmatmul.mubr.msk.bf16.vlgmr.msra.gmra.mxu1 %vm832_vm2, %v855_v47 }
 0x483   : > { %2819 = vmatprep.mubr.msk.bf16.mxu1 %vm3396_vm0, %v3394_v4 }
 0x4de   : > { %v972_v49 = vpop.xlane.xlu0 %971 }
 0x4df   : > { %3118 = vrcp.f32 %v972_v49  ;;  %v3019_v49 = vld [vmem:[#allocation7 + $0x20] sm:$0xff]  }
 0x4e2   : > { %v983_v50 = vpop.permute.xlu0 %982  ;;  %v975_v51 = vpop.xlane.xlu1 %974 }
 0x4e3   : > { %3120 = vrcp.f32 %v975_v51  ;;  %2818 = vmatpush3.bf16.msra.mxu1 %v983_v50 }
 0x4e4   : > { %2831 = vmatprep.subr.bf16.mxu1 %v3394_v4 }
 0x4e6   : > { %v1149_v8 = vpop.permute.xlu1 %1148 }
 0x4e7   : > { %v1154_v12 = vsel %vm784_vm1, %v1149_v8, 0 }
 0x4ea   : > { %v1147_v13 = vpop.permute.xlu1 %1146 }
 0x4ec   : > { %v3119_v52 = vpop.eup %3118 }
 0x4ed   : > { %v978_v54 = vmul.f32 %v3119_v52, %v3111_v37 }
 0x4f0   : > { %v3121_v53 = vpop.eup %3120 }
 0x4f1   : > { %v979_v55 = vmul.f32 %v3121_v53, %v3113_v39 }
 0x4f3   : > { %v980_v57 = vpack.c.bf16 %v979_v55, %v978_v54 }
 0x4f5   : > { %2820 = vmatmul.mubr.msk.bf16.vlgmr.msra.gmra.mxu1 %vm832_vm2, %v980_v57 }
 0x4f6   : > { %2832 = vmatpush3.bf16.msra.mxu1 %v3014_v56  ;;  %2835 = vmatprep.mubr.msk.bf16.mxu1 %vm3396_vm0, %v3394_v4 }
 0x4f7   : > { %2833 = vmatprep.subr.bf16.mxu1 %v3394_v4 }
 0x4fa   : > { %2834 = vmatpush3.bf16.msra.mxu1 %v3015_v58 }
 0x4fb   : > { %2845 = vmatprep.subr.bf16.mxu1 %v3394_v4 }
 0x542   : > { %v893_v60 = vpop.f32.mrf.mxu1 }
 0x544   : > { %v2809_v62 = vpop.f32.mrf.mxu1 }
 0x546   : > { %v896_v63 = vpop.f32.mrf.mxu1 }
 0x547   : > { %v900_v3 = vpack.c.bf16 %v896_v63, %v893_v60 }
 0x548   : > { %v2810_v5 = vpop.f32.mrf.mxu1 }
 0x549   : > { %2836 = vmatmul.mubr.msk.bf16.vlgmr.msra.gmra.mxu1 %vm784_vm1, %v900_v3 }
 0x54a   : > { %2847 = vmatprep.mubr.msk.bf16.mxu1 %vm3396_vm0, %v3394_v4 }
 0x5b5   : > { %v1022_v6 = vpop.f32.mrf.mxu1 }
 0x5b7   : > { %v2821_v7 = vpop.f32.mrf.mxu1 }
 0x5b9   : > { %v1025_v9 = vpop.f32.mrf.mxu1 }
 0x5ba   : > { %v1029_v10 = vpack.c.bf16 %v1025_v9, %v1022_v6 }
 0x5bb   : > { %v2822_v11 = vpop.f32.mrf.mxu1 }
 0x5bc   : > { %2828 = vmatmul.mubr.msk.bf16.vlgmr.msra.gmra.mxu0 %vm784_vm1, %v1029_v10 }
 0x5bd   : > { %2840 = vmatpush3.bf16.xpose.msra.mxu0 %v1154_v12  ;;  %2841 = vmatprep.mubr.msk.bf16.mxu0 %vm3396_vm0, %v3394_v4 }
 0x5be   : > { %2851 = vmatprep.subr.bf16.mxu0 %v3394_v4 }
 0x5c4   : > { %2842 = vmatmul.mubr.msk.bf16.vlgmr.msra.gmra.mxu0 %vm784_vm1, %v1147_v13 }
 0x5c5   : > { %2855 = vmatprep.mubr.msk.bf16.mxu0 %vm3396_vm0, %v3394_v4  ;;  %2852 = vmatpush3.bf16.msra.mxu0 %v3018_v48 }
 0x5c6   : > { %2853 = vmatprep.subr.bf16.mxu0 %v3394_v4 }
 0x5c9   : > { %2854 = vmatpush3.bf16.msra.mxu0 %v3019_v49 }
 0x5ca   : > { %2865 = vmatprep.subr.bf16.mxu0 %v3394_v4 }
 0x609   : > { %v3730_v14 = vpop.f32.mrf.mxu1 }
 0x60b   : > { %v2837_v15 = vpop.f32.mrf.mxu1 }
 0x60d   : > { %v3732_v16 = vpop.f32.mrf.mxu1 }
 0x60f   : > { %v2838_v17 = vpop.f32.mrf.mxu1 }
 0x67c   : > { %v3734_v18 = vpop.f32.mrf.mxu0 }
 0x67d   : > { %v1140_v12 = vadd.f32 %v3730_v14, %v3734_v18  ;;  %v3020_v18 = vld [vmem:[#allocation7 + $0x38] sm:$0xff]  }
 0x67e   : > { %v2829_v19 = vpop.f32.mrf.mxu0 }
 0x680   : > { %v3736_v20 = vpop.f32.mrf.mxu0 }
 0x681   : > { %v1143_v19 = vadd.f32 %v3732_v16, %v3736_v20  ;;  %v3021_v16 = vld [vmem:[#allocation7 + $0x30] sm:$0xff]  }
 0x682   : > { %v2830_v21 = vpop.f32.mrf.mxu0 }
 0x684   : > { %v1190_v22 = vpop.f32.mrf.mxu0 }
 0x685   : > { %v1197_v23 = vsel %vm832_vm2, %v1190_v22, -inf }
 0x686   : > { %1198 = vmax.xlane.f32.xlu1 %v1197_v23  ;;  %v2843_v24 = vpop.f32.mrf.mxu0 }
 0x688   : > { %v1193_v25 = vpop.f32.mrf.mxu0 }
 0x689   : > { %v1200_v26 = vsel %vm832_vm2, %v1193_v25, -inf }
 0x68a   : > { %1201 = vmax.xlane.f32.xlu0 %v1200_v26  ;;  %v2844_v28 = vpop.f32.mrf.mxu0 }
 0x697   : > { %1220 = vrot.lane.b32.xlu1 %v3670_v61, %s3398_s19  ;;  %s2449_s19 = sshll.u32 %s489_s14, 4  ;;  %s3943_s19 = int_to_ptr.vmem [resolvable:$true] %s2449_s19 }
 0x698   : > { %s3307_s26 = scalar_lea.vmem %s3943_s19, 256 }
 0x699   : > { %p3308_p12 = scmp.ne.s32.totalorder %s3943_s19, %s3307_s26 }
 0x69b   : > { %1330 = vrot.lane.b32.xlu1 %v3672_v1, %s3399_s13  ;;  %p3309_p9 = pnand %p3308_p12, %p4034_p7 }
 0x69d   : > { %p3310_p13 = pneg %p3309_p9 }
 0x70f   : > { %v1199_v29 = vpop.xlane.xlu1 %1198 }
 0x710   : > { %v1203_v30 = vsub.f32 %v1190_v22, %v1199_v29 }
 0x712   : > { %v1205_v31 = vmul.f32 1.442695, %v1203_v30 }
 0x713   : > { %v1221_v32 = vpop.permute.xlu1 %1220  ;;  %v1202_v33 = vpop.xlane.xlu0 %1201 }
 0x714   : > { %3122 = vpow2.f32 %v1205_v31  ;;  %v1204_v34 = vsub.f32 %v1193_v25, %v1202_v33  ;;  %2846 = vmatpush3.bf16.msra.mxu1 %v1221_v32 }
 0x715   : > { %2859 = vmatprep.subr.bf16.mxu1 %v3394_v4 }
 0x716   : > { %v1207_v35 = vmul.f32 1.442695, %v1204_v34 }
 0x718   : > { %3124 = vpow2.f32 %v1207_v35 }
 0x721   : > { %v3123_v36 = vpop.eup %3122 }
 0x722   : > { %v1209_v37 = vsel %vm832_vm2, %v3123_v36, 0.0 }
 0x723   : > { %1210 = vadd.xlane.f32.xlu0 %v1209_v37 }
 0x725   : > { %v3125_v38 = vpop.eup %3124 }
 0x726   : > { %v1212_v39 = vsel %vm832_vm2, %v3125_v38, 0.0 }
 0x727   : > { %1213 = vadd.xlane.f32.xlu0 %v1212_v39 }
 0x73d   : > { %1332 = vrot.lane.b32.xlu0 %v3674_v2, %s3399_s13  ;;  %v1331_v2 = vpop.permute.xlu1 %1330 }
 0x7ac   : > { %v1211_v1 = vpop.xlane.xlu0 %1210 }
 0x7ad   : > { %3126 = vrcp.f32 %v1211_v1 }
 0x7b0   : > { %v1214_v40 = vpop.xlane.xlu0 %1213 }
 0x7b1   : > { %3128 = vrcp.f32 %v1214_v40 }
 0x7b4   : > { %v1333_v45 = vpop.permute.xlu0 %1332 }
 0x7b5   : > { %v1338_v47 = vsel %vm784_vm1, %v1333_v45, 0  ;;  %v3024_v45 = vld [vmem:[#allocation8 + $0xe4] ss:$16 sps:$4 sm:$0xff]  }
 0x7ba   : > { %v3127_v41 = vpop.eup %3126 }
 0x7bb   : > { %v1217_v43 = vmul.f32 %v3127_v41, %v3123_v36 }
 0x7be   : > { %v3129_v42 = vpop.eup %3128 }
 0x7bf   : > { %v1218_v44 = vmul.f32 %v3129_v42, %v3125_v38  ;;  %v2623_v38 = vld [vmem:[%s4001_s9] ss:$0 sm:$0xff]  ;;  %v3174_v42 = vld [vmem:[%s3617_s30 + $0x8] sm:$0xff] }
 0x7c1   : > { %v1219_v46 = vpack.c.bf16 %v1218_v44, %v1217_v43 }
 0x7c3   : > { %2848 = vmatmul.mubr.msk.bf16.vlgmr.msra.gmra.mxu1 %vm832_vm2, %v1219_v46  ;;  %v3025_v46 = vld [vmem:[#allocation8 + $0xe8] ss:$16 sps:$4 sm:$0xff]  }
 0x7c4   : > { %2860 = vmatpush3.bf16.xpose.msra.mxu1 %v1338_v47  ;;  %2861 = vmatprep.mubr.msk.bf16.mxu1 %vm3396_vm0, %v3394_v4  ;;  %v3027_v47 = vld [vmem:[#allocation8 + $0xec] ss:$16 sps:$4 sm:$0xff]  }
 0x7c5   : > { %2871 = vmatprep.subr.bf16.mxu1 %v3394_v4 }
 0x7cb   : > { %2862 = vmatmul.mubr.msk.bf16.vlgmr.msra.gmra.mxu1 %vm784_vm1, %v1331_v2 }
 0x7cc   : > { %2875 = vmatprep.mubr.msk.bf16.mxu1 %vm3396_vm0, %v3394_v4  ;;  %2872 = vmatpush3.bf16.msra.mxu1 %v3020_v18 }
 0x7cd   : > { %2873 = vmatprep.subr.bf16.mxu1 %v3394_v4 }
 0x7d0   : > { %2874 = vmatpush3.bf16.msra.mxu1 %v3021_v16 }
 0x7d1   : > { %1823 = vmatprep.subr.bf16.mxu1 %v3027_v47  ;;  %v3078_v47 = vld [vmem:[#allocation10 + $0x68] sm:$0xff]  }
 0x883   : > { %v1260_v50 = vpop.f32.mrf.mxu1 }
 0x885   : > { %v2849_v51 = vpop.f32.mrf.mxu1 }
 0x887   : > { %v1263_v52 = vpop.f32.mrf.mxu1 }
 0x888   : > { %v1267_v53 = vpack.c.bf16 %v1263_v52, %v1260_v50 }
 0x889   : > { %v2850_v54 = vpop.f32.mrf.mxu1 }
 0x88a   : > { %2856 = vmatmul.mubr.msk.bf16.vlgmr.msra.gmra.mxu0 %vm784_vm1, %v1267_v53  ;;  %v3030_v54 = vld [vmem:[#allocation8 + $0xc4] ss:$16 sps:$4 sm:$0xff]  }
 0x88b   : > { %v1374_v55 = vpop.f32.mrf.mxu1  ;;  %2867 = vmatprep.mubr.msk.bf16.mxu0 %vm3396_vm0, %v3394_v4 }
 0x88c   : > { %v1381_v56 = vsel %vm832_vm2, %v1374_v55, -inf }
 0x88d   : > { %1382 = vmax.xlane.f32.xlu1 %v1381_v56  ;;  %v2863_v57 = vpop.f32.mrf.mxu1  ;;  %v3028_v56 = vld [vmem:[#allocation8 + $0xc0] ss:$16 sps:$4 sm:$0xff]  }
 0x88e   : > { %v3031_v57 = vld [vmem:[#allocation8 + $0xc8] ss:$16 sps:$4 sm:$0xff]  }
 0x88f   : > { %v1377_v58 = vpop.f32.mrf.mxu1 }
 0x890   : > { %v1384_v59 = vsel %vm832_vm2, %v1377_v58, -inf }
 0x891   : > { %1385 = vmax.xlane.f32.xlu0 %v1384_v59  ;;  %v2864_v60 = vpop.f32.mrf.mxu1  ;;  %v3039_v59 = vld [vmem:[#allocation8 + $0xac] ss:$16 sps:$4 sm:$0xff]  }
 0x892   : > { %v3034_v60 = vld [vmem:[#allocation8 + $0xa0] ss:$16 sps:$4 sm:$0xff]  }
 0x916   : > { %v1383_v62 = vpop.xlane.xlu1 %1382 }
 0x917   : > { %v1387_v63 = vsub.f32 %v1374_v55, %v1383_v62  ;;  %v3033_v55 = vld [vmem:[#allocation8 + $0xcc] ss:$16 sps:$4 sm:$0xff]   ;;  %v3037_v62 = vld [vmem:[#allocation8 + $0xa8] ss:$16 sps:$4 sm:$0xff]  }
 0x919   : > { %v1389_v3 = vmul.f32 1.442695, %v1387_v63  ;;  %v3040_v63 = vld [vmem:[#allocation8 + $0x80] ss:$16 sps:$4 sm:$0xff]  }
 0x91a   : > { %v1386_v5 = vpop.xlane.xlu0 %1385 }
 0x91b   : > { %3130 = vpow2.f32 %v1389_v3  ;;  %v1388_v6 = vsub.f32 %v1377_v58, %v1386_v5  ;;  %v3036_v58 = vld [vmem:[#allocation8 + $0xa4] ss:$16 sps:$4 sm:$0xff]   ;;  %v3043_v5 = vld [vmem:[#allocation8 + $0x88] ss:$16 sps:$4 sm:$0xff]  }
 0x91c   : > { %v3042_v3 = vld [vmem:[#allocation8 + $0x84] ss:$16 sps:$4 sm:$0xff]  }
 0x91d   : > { %v1391_v7 = vmul.f32 1.442695, %v1388_v6  ;;  %v3045_v6 = vld [vmem:[#allocation8 + $0x8c] ss:$16 sps:$4 sm:$0xff]  }
 0x91f   : > { %3132 = vpow2.f32 %v1391_v7  ;;  %v3048_v7 = vld [vmem:[#allocation8 + $0x64] ss:$16 sps:$4 sm:$0xff]  }
 0x928   : > { %v3131_v8 = vpop.eup %3130 }
 0x929   : > { %v1393_v9 = vsel %vm832_vm2, %v3131_v8, 0.0 }
 0x92a   : > { %1394 = vadd.xlane.f32.xlu0 %v1393_v9  ;;  %v3046_v9 = vld [vmem:[#allocation8 + $0x60] ss:$16 sps:$4 sm:$0xff]  }
 0x92c   : > { %v3133_v10 = vpop.eup %3132 }
 0x92d   : > { %v1396_v11 = vsel %vm832_vm2, %v3133_v10, 0.0 }
 0x92e   : > { %1397 = vadd.xlane.f32.xlu1 %v1396_v11  ;;  %v3054_v11 = vld [vmem:[#allocation8 + $0x44] ss:$16 sps:$4 sm:$0xff]  }
 0x940   : > { %1404 = vrot.lane.b32.xlu0 %v3670_v61, %s3399_s13  ;;  %s2697_s13 = sshll.u32 %s3489_s25, 8  ;;  %s3400_s25 = smov [#allocation11]  }
 0x941   : > { %s3948_s2 = scalar_lea.hbm %s4004_s12, %s2697_s13  ;;  %s3311_s15 = sshll.u32 %s3400_s25, 4  ;;  %s3312_s15 = int_to_ptr.vmem [resolvable:$false] %s3311_s15 }
 0x942   : > { %s3313_s30 = scalar_lea.vmem %s3312_s15, 512  ;;  %p3314_p5 = scmp.lt.s32.totalorder %s3943_s19, %s3312_s15 }
 0x943   : > { %p3315_p10 = scmp.lt.s32.totalorder %s3313_s30, %s3307_s26 }
 0x945   : > { %p3316_p1 = por %p3315_p10, %p3314_p5 }
 0x947   : > { %p3317_p2 = pnand %p3316_p1, %p3310_p13 }
 0x94a   : > { %v1321_v13 = vpop.f32.mrf.mxu0 }
 0x94b   : > { %v1328_v15 = vadd.f32 %v1321_v13, %v1140_v12  ;;  %v3057_v12 = vld [vmem:[#allocation8 + $0x4c] ss:$16 sps:$4 sm:$0xff]   ;;  %v3052_v13 = vld [vmem:[#allocation8 + $0x40] ss:$16 sps:$4 sm:$0xff]  }
 0x94c   : > { %v2857_v17 = vpop.f32.mrf.mxu0 }
 0x94d   : > { %v3060_v17 = vld [vmem:[#allocation8 + $0x24] ss:$16 sps:$4 sm:$0xff]  }
 0x94e   : > { %v1324_v21 = vpop.f32.mrf.mxu0 }
 0x94f   : > { %v1329_v22 = vadd.f32 %v1324_v21, %v1143_v19  ;;  %v3063_v19 = vld [vmem:[#allocation8 + $0x2c] ss:$16 sps:$4 sm:$0xff]   ;;  %v3058_v21 = vld [vmem:[#allocation8 + $0x20] ss:$16 sps:$4 sm:$0xff]  }
 0x950   : > { %v2858_v23 = vpop.f32.mrf.mxu0 }
 0x951   : > { %v3066_v23 = vld [vmem:[#allocation8 + $0x4] ss:$16 sps:$4 sm:$0xff]  }
 0x9b3   : > { %v1395_v24 = vpop.xlane.xlu0 %1394 }
 0x9b4   : > { %3134 = vrcp.f32 %v1395_v24  ;;  %v3069_v24 = vld [vmem:[#allocation8 + $0xc] ss:$16 sps:$4 sm:$0xff]  }
 0x9b7   : > { %v1398_v25 = vpop.xlane.xlu1 %1397  ;;  %v1405_v26 = vpop.permute.xlu0 %1404 }
 0x9b8   : > { %3136 = vrcp.f32 %v1398_v25  ;;  %2866 = vmatpush3.bf16.msra.mxu0 %v1405_v26  ;;  %v3064_v25 = vld [vmem:[#allocation8] ss:$16 sps:$4 sm:$0xff]   ;;  %v3067_v26 = vld [vmem:[#allocation8 + $0x8] ss:$16 sps:$4 sm:$0xff]  }
 0x9b9   : > { %1780 = vmatprep.subr.bf16.mxu0 %v3024_v45  ;;  %v3076_v45 = vld [vmem:[#allocation10 + $0x30] sm:$0xff]  }
 0x9c1   : > { %v3135_v28 = vpop.eup %3134 }
 0x9c2   : > { %v1401_v29 = vmul.f32 %v3135_v28, %v3131_v8  ;;  %v3051_v8 = vld [vmem:[#allocation8 + $0x6c] ss:$16 sps:$4 sm:$0xff]  }
 0x9c5   : > { %v3137_v61 = vpop.eup %3136 }
 0x9c6   : > { %v1402_v30 = vmul.f32 %v3137_v61, %v3133_v10  ;;  %v3049_v10 = vld [vmem:[#allocation8 + $0x68] ss:$16 sps:$4 sm:$0xff]  }
 0x9c8   : > { %v1403_v14 = vpack.c.bf16 %v1402_v30, %v1401_v29 }
 0x9ca   : > { %2868 = vmatmul.mubr.msk.bf16.vlgmr.msra.gmra.mxu0 %vm832_vm2, %v1403_v14 }
 0x9cb   : > { %1812 = vmatprep.mubr.bf16.mxu0 %v3395_v27 }
 0xa8a   : > { %v1444_v20 = vpop.f32.mrf.mxu0 }
 0xa8c   : > { %v2869_v31 = vpop.f32.mrf.mxu0 }
 0xa8d   : > { %v2624_v31 = vld [vmem:[%s3999_s7] ss:$0 sm:$0xff] }
 0xa8e   : > { %v1447_v32 = vpop.f32.mrf.mxu0 }
 0xa8f   : > { %v1451_v33 = vpack.c.bf16 %v1447_v32, %v1444_v20 }
 0xa90   : > { %v2870_v34 = vpop.f32.mrf.mxu0 }
 0xa91   : > { %2876 = vmatmul.mubr.msk.bf16.vlgmr.msra.gmra.mxu1 %vm784_vm1, %v1451_v33 }
 0xa92   : > { %1855 = vmatprep.mubr.bf16.mxu1 %v3395_v27  ;;  %v3022_v27 = vld [vmem:[#allocation8 + $0xe0] ss:$16 sps:$4 sm:$0xff]   ;;  %1824 = vmatpush1.bf16.msra.mxu1 %v3025_v46 }
 0xa93   : > { %1781 = vmatpush1.bf16.msra.mxu0 %v3022_v27  ;;  %1825 = vmatprep.subr.bf16.mxu1 %v3033_v55  ;;  %v3075_v27 = vld [vmem:[#allocation10 + $0xf0] sm:$0xff]   ;;  %v3088_v55 = vld [vmem:[#allocation10 + $0x18] sm:$0xff]  }
 0xa94   : > { %1782 = vmatprep.subr.bf16.mxu0 %v3030_v54  ;;  %v3077_v46 = vld [vmem:[#allocation10 + $0xb0] sm:$0xff]   ;;  %v3087_v54 = vld [vmem:[#allocation10 + $0xd8] sm:$0xff]  }
 0xa96   : > { %1826 = vmatpush1.bf16.msra.mxu1 %v3031_v57  ;;  %v3090_v57 = vld [vmem:[#allocation10 + $0x50] sm:$0xff]  }
 0xa97   : > { %1783 = vmatpush1.bf16.msra.mxu0 %v3028_v56  ;;  %1827 = vmatprep.subr.bf16.mxu1 %v3039_v59  ;;  %v3089_v56 = vld [vmem:[#allocation10 + $0x98] sm:$0xff]   ;;  %v3092_v59 = vld [vmem:[#allocation10 + $0x10] sm:$0xff]  }
 0xa98   : > { %1784 = vmatprep.subr.bf16.mxu0 %v3036_v58  ;;  %v3091_v58 = vld [vmem:[#allocation10 + $0xd0] sm:$0xff]  }
 0xa9a   : > { %1828 = vmatpush1.bf16.msra.mxu1 %v3037_v62  ;;  %v3094_v62 = vld [vmem:[#allocation10 + $0x48] sm:$0xff]  }
 0xa9b   : > { %1785 = vmatpush1.bf16.msra.mxu0 %v3034_v60  ;;  %1829 = vmatprep.subr.bf16.mxu1 %v3045_v6  ;;  %v3093_v60 = vld [vmem:[#allocation10 + $0x90] sm:$0xff]   ;;  %v3098_v6 = vld [vmem:[#allocation10 + $0x40] sm:$0xff]  }
 0xa9c   : > { %1786 = vmatprep.subr.bf16.mxu0 %v3042_v3  ;;  %v3096_v3 = vld [vmem:[#allocation10 + $0x8] sm:$0xff]  }
 0xa9e   : > { %1830 = vmatpush1.bf16.msra.mxu1 %v3043_v5  ;;  %v3097_v5 = vld [vmem:[#allocation10 + $0x88] sm:$0xff]  }
 0xa9f   : > { %1787 = vmatpush1.bf16.msra.mxu0 %v3040_v63  ;;  %1831 = vmatprep.subr.bf16.mxu1 %v3051_v8  ;;  %v3095_v63 = vld [vmem:[#allocation10 + $0xc8] sm:$0xff]   ;;  %v3100_v8 = vld [vmem:[#allocation10] sm:$0xff]  }
 0xaa0   : > { %1788 = vmatprep.subr.bf16.mxu0 %v3048_v7  ;;  %v3099_v7 = vld [vmem:[#allocation10 + $0xc0] sm:$0xff]  }
 0xaa2   : > { %1832 = vmatpush1.bf16.msra.mxu1 %v3049_v10  ;;  %v1600_v10 = vlaneseq }
 0xaa3   : > { %1789 = vmatpush1.bf16.msra.mxu0 %v3046_v9  ;;  %1833 = vmatprep.subr.bf16.mxu1 %v3057_v12  ;;  %v3101_v9 = vld [vmem:[#allocation10 + $0x80] sm:$0xff]  }
 0xaa4   : > { %1790 = vmatprep.subr.bf16.mxu0 %v3054_v11  ;;  %v1601_v11 = vshrl.u32 %v1600_v10, 7 }
 0xaa6   : > { %v1602_v12 = vsub.s32 0, %v1601_v11 }
 0xaa7   : > { %1791 = vmatpush1.bf16.msra.mxu0 %v3052_v13  ;;  %v1610_v13 = vsub.s32 2, %v1601_v11 }
 0xaa8   : > { %1792 = vmatprep.subr.bf16.mxu0 %v3060_v17  ;;  %v1606_v17 = vsub.s32 1, %v1601_v11 }
 0xaab   : > { %1793 = vmatpush1.bf16.msra.mxu0 %v3058_v21 }
 0xaac   : > { %1794 = vmatprep.subr.bf16.mxu0 %v3066_v23 }
 0xaaf   : > { %1795 = vmatpush1.bf16.msra.mxu0 %v3064_v25 }
 0xb51   : > { %v1505_v35 = vpop.f32.mrf.mxu1 }
 0xb52   : > { %v1512_v36 = vadd.f32 %v1505_v35, %v1328_v15  ;;  %v3055_v15 = vld [vmem:[#allocation8 + $0x48] ss:$16 sps:$4 sm:$0xff]   ;;  %v2625_v35 = vld [vmem:[%s4000_s8] ss:$0 sm:$0xff] }
 0xb53   : > { %v2877_v37 = vpop.f32.mrf.mxu1  ;;  %1834 = vmatpush1.bf16.msra.mxu1 %v3055_v15  ;;  %v1598_v15 = vld [vmem:[%s4002_s10] sm:$0xf] }
 0xb54   : > { %v1514_v4 = vadd.f32 %v1512_v36, %v3632_v0  ;;  %1835 = vmatprep.subr.bf16.mxu1 %v3063_v19  ;;  %v1614_v19 = vsub.s32 3, %v1601_v11  ;;  %v1603_v21 = vrot.slane %v1598_v15, %v1602_v12  ;;  %v1607_v25 = vrot.slane %v1598_v15, %v1606_v17 }
 0xb55   : > { %v1508_v39 = vpop.f32.mrf.mxu1 }
 0xb56   : > { %v1513_v1 = vadd.f32 %v1508_v39, %v1329_v22  ;;  %v3781_v40 = vadd.f32 %v2623_v38, %v1514_v4  ;;  %v3061_v22 = vld [vmem:[#allocation8 + $0x28] ss:$16 sps:$4 sm:$0xff]  }
 0xb57   : > { %v2878_v41 = vpop.f32.mrf.mxu1  ;;  %1836 = vmatpush1.bf16.msra.mxu1 %v3061_v22  ;;  %v3070_v39 = vld [vmem:[#allocation10 + $0x78] sm:$0xff]   ;;  %v1611_v22 = vrot.slane %v1598_v15, %v1610_v13 }
 0xb58   : > { %v1515_v43 = vadd.f32 %v3174_v42, %v1513_v1  ;;  %1527 = vadd.xlane.f32.xlu1 %v3781_v40  ;;  %1837 = vmatprep.subr.bf16.mxu1 %v3069_v24  ;;  %v3071_v1 = vld [vmem:[#allocation10 + $0xf8] sm:$0xff]  }
 0xb59   : > { %v3072_v41 = vld [vmem:[#allocation10 + $0x38] sm:$0xff]   ;;  %2735 = vmatprep.subr.bf16.mxu0 %v3070_v39 }
 0xb5a   : > { %v3785_v44 = vadd.f32 %v2623_v38, %v1515_v43  ;;  %v3073_v42 = vld [vmem:[#allocation10 + $0xb8] sm:$0xff]   ;;  %v3074_v43 = vld [vmem:[#allocation10 + $0x70] sm:$0xff]  }
 0xb5b   : > { %1838 = vmatpush1.bf16.msra.mxu1 %v3067_v26  ;;  %v1615_v26 = vrot.slane %v1598_v15, %v1614_v19 }
 0xb5c   : > { %1529 = vadd.xlane.f32.xlu1 %v3785_v44  ;;  %2757 = vmatprep.subr.bf16.mxu1 %v3071_v1 }
 0xbe1   : > { %v1528_v0 = vpop.xlane.xlu1 %1527 }
 0xbe2   : > { %v1531_v2 = vmul.f32 0.0078125, %v1528_v0  ;;  %v3079_v0 = vld [vmem:[#allocation10 + $0xe8] sm:$0xff]  }
 0xbe4   : > { %v3789_v48 = vsub.f32 %v3781_v40, %v1531_v2  ;;  %v3080_v2 = vld [vmem:[#allocation10 + $0x28] sm:$0xff]  }
 0xbe5   : > { %v1530_v49 = vpop.xlane.xlu1 %1529 }
 0xbe6   : > { %v1532_v50 = vmul.f32 0.0078125, %v1530_v49  ;;  %v1535_v51 = vmul.f32 %v3789_v48, %v3789_v48  ;;  %v3082_v49 = vld [vmem:[#allocation10 + $0x60] sm:$0xff]  }
 0xbe8   : > { %v3794_v52 = vsub.f32 %v3785_v44, %v1532_v50  ;;  %1537 = vadd.xlane.f32.xlu1 %v1535_v51  ;;  %v3083_v50 = vld [vmem:[#allocation10 + $0xe0] sm:$0xff]  }
 0xbe9   : > { %v3084_v51 = vld [vmem:[#allocation10 + $0x20] sm:$0xff]  }
 0xbea   : > { %v1536_v53 = vmul.f32 %v3794_v52, %v3794_v52 }
 0xbec   : > { %1539 = vadd.xlane.f32.xlu1 %v1536_v53  ;;  %v3086_v53 = vld [vmem:[#allocation10 + $0x58] sm:$0xff]  }
 0xc71   : > { %v1538_v28 = vpop.xlane.xlu1 %1537 }
 0xc72   : > { %v1541_v61 = vmul.f32 0.0078125, %v1538_v28 }
 0xc74   : > { %v1543_v29 = vadd.f32 1e-05, %v1541_v61 }
 0xc75   : > { %v1540_v30 = vpop.xlane.xlu1 %1539 }
 0xc76   : > { %3138 = vrsqrt.f32 %v1543_v29  ;;  %v1542_v14 = vmul.f32 0.0078125, %v1540_v30 }
 0xc78   : > { %v1544_v18 = vadd.f32 1e-05, %v1542_v14 }
 0xc7a   : > { %3140 = vrsqrt.f32 %v1544_v18 }
 0xc83   : > { %v3139_v16 = vpop.eup %3138 }
 0xc84   : > { %v1547_v20 = vmul.f32 %v3139_v16, %v3789_v48  ;;  %v3081_v48 = vld [vmem:[#allocation10 + $0xa8] sm:$0xff]  }
 0xc86   : > { %v1555_v34 = vmul.f32 %v2624_v31, %v1547_v20 }
 0xc87   : > { %v3141_v32 = vpop.eup %3140 }
 0xc88   : > { %v1548_v33 = vmul.f32 %v3141_v32, %v3794_v52  ;;  %v1563_v37 = vadd.f32 %v2625_v35, %v1555_v34  ;;  %v3085_v52 = vld [vmem:[#allocation10 + $0xa0] sm:$0xff]  }
 0xc8a   : > { %v1556_v36 = vmul.f32 %v2624_v31, %v1548_v33 }
 0xc8c   : > { %v1564_v38 = vadd.f32 %v2625_v35, %v1556_v36 }
 0xc8e   : > { %v1565_v4 = vpack.c.bf16 %v1564_v38, %v1563_v37 }
 0xc90   : > { %1813 = vmatmul.mubr.bf16.vlgmr.msra.gmra.mxu0 %v1565_v4  ;;  %1856 = vmatmul.mubr.bf16.vlgmr.msra.gmra.mxu1 %v1565_v4 }
 0xc91   : > { %2736 = vmatpush3.bf16.msra.mxu0 %v3072_v41  ;;  %2758 = vmatpush3.bf16.msra.mxu1 %v3073_v42 }
 0xc92   : > { %2737 = vmatprep.subr.bf16.mxu0 %v3074_v43  ;;  %2759 = vmatprep.subr.bf16.mxu1 %v3075_v27 }
 0xc95   : > { %2738 = vmatpush3.bf16.msra.mxu0 %v3076_v45  ;;  %2760 = vmatpush3.bf16.msra.mxu1 %v3077_v46 }
 0xc96   : > { %2739 = vmatprep.subr.bf16.mxu0 %v3078_v47  ;;  %2761 = vmatprep.subr.bf16.mxu1 %v3079_v0 }
 0xc99   : > { %2740 = vmatpush3.bf16.msra.mxu0 %v3080_v2  ;;  %2762 = vmatpush3.bf16.msra.mxu1 %v3081_v48 }
 0xc9a   : > { %2741 = vmatprep.subr.bf16.mxu0 %v3082_v49  ;;  %2763 = vmatprep.subr.bf16.mxu1 %v3083_v50 }
 0xc9d   : > { %2742 = vmatpush3.bf16.msra.mxu0 %v3084_v51  ;;  %2764 = vmatpush3.bf16.msra.mxu1 %v3085_v52 }
 0xc9e   : > { %2743 = vmatprep.subr.bf16.mxu0 %v3086_v53  ;;  %2765 = vmatprep.subr.bf16.mxu1 %v3087_v54 }
 0xca1   : > { %2744 = vmatpush3.bf16.msra.mxu0 %v3088_v55  ;;  %2766 = vmatpush3.bf16.msra.mxu1 %v3089_v56 }
 0xca2   : > { %2745 = vmatprep.subr.bf16.mxu0 %v3090_v57  ;;  %2767 = vmatprep.subr.bf16.mxu1 %v3091_v58 }
 0xca5   : > { %2746 = vmatpush3.bf16.msra.mxu0 %v3092_v59  ;;  %2768 = vmatpush3.bf16.msra.mxu1 %v3093_v60 }
 0xca6   : > { %2747 = vmatprep.subr.bf16.mxu0 %v3094_v62  ;;  %2769 = vmatprep.subr.bf16.mxu1 %v3095_v63 }
 0xca9   : > { %2748 = vmatpush3.bf16.msra.mxu0 %v3096_v3  ;;  %2770 = vmatpush3.bf16.msra.mxu1 %v3097_v5 }
 0xcaa   : > { %2749 = vmatprep.subr.bf16.mxu0 %v3098_v6  ;;  %2771 = vmatprep.subr.bf16.mxu1 %v3099_v7 }
 0xcad   : > { %2750 = vmatpush3.bf16.msra.mxu0 %v3100_v8  ;;  %2772 = vmatpush3.bf16.msra.mxu1 %v3101_v9 }
 0xd50   : > { %v1814_v23 = vpop.f32.mrf.mxu0  ;;  %v1857_v24 = vpop.f32.mrf.mxu1 }
 0xd51   : > { %v3809_v28 = vadd.f32 %v1814_v23, %v1603_v21  ;;  %v3811_v61 = vadd.f32 %v1857_v24, %v1611_v22 }
 0xd52   : > { %v1816_v29 = vpop.f32.mrf.mxu0  ;;  %v1859_v30 = vpop.f32.mrf.mxu1 }
 0xd53   : > { %v3814_v14 = vmul.f32 0.70710677, %v3809_v28  ;;  %v3817_v18 = vmul.f32 0.70710677, %v3811_v61  ;;  %v3819_v16 = vadd.f32 %v1816_v29, %v1607_v25  ;;  %v3821_v20 = vadd.f32 %v1859_v30, %v1615_v26 }
 0xd54   : > { %v1818_v37 = vpop.f32.mrf.mxu0  ;;  %v1861_v27 = vpop.f32.mrf.mxu1 }
 0xd55   : > { %v1882_v31 = vand.u32 2147483647, %v3814_v14  ;;  %v1884_v32 = vand.u32 2147483647, %v3817_v18  ;;  %v3826_v33 = vmul.f32 0.70710677, %v3819_v16  ;;  %v3833_v43 = vadd.f32 %v1818_v37, %v1603_v21 }
 0xd56   : > { %v3829_v34 = vmul.f32 0.70710677, %v3821_v20  ;;  %v1820_v45 = vpop.f32.mrf.mxu0  ;;  %v3838_v2 = vadd.f32 %v1861_v27, %v1611_v22  ;;  %v1863_v50 = vpop.f32.mrf.mxu1  ;;  %vm2042_vm4 = vcmp.ge.f32.partialorder %v3814_v14, 0.0  ;;  %vm2044_vm6 = vcmp.ge.f32.partialorder %v3817_v18, 0.0 }
 0xd57   : > { %v1890_v35 = vmul.f32 0.3275911, %v1882_v31  ;;  %v1892_v36 = vmul.f32 0.3275911, %v1884_v32  ;;  %v1883_v38 = vand.u32 2147483647, %v3826_v33  ;;  %v3840_v48 = vadd.f32 %v1820_v45, %v1607_v25 }
 0xd58   : > { %v1885_v4 = vand.u32 2147483647, %v3829_v34  ;;  %v3836_v0 = vmul.f32 0.70710677, %v3833_v43  ;;  %v3844_v51 = vmul.f32 0.70710677, %v3838_v2  ;;  %v3850_v55 = vadd.f32 %v1863_v50, %v1615_v26 }
 0xd59   : > { %v1898_v39 = vadd.f32 1.0, %v1890_v35  ;;  %v1900_v1 = vadd.f32 1.0, %v1892_v36  ;;  %v1891_v41 = vmul.f32 0.3275911, %v1883_v38  ;;  %v3847_v53 = vmul.f32 0.70710677, %v3840_v48 }
 0xd5a   : > { %v1893_v42 = vmul.f32 0.3275911, %v1885_v4  ;;  %v1886_v49 = vand.u32 2147483647, %v3836_v0  ;;  %v1888_v54 = vand.u32 2147483647, %v3844_v51 }
 0xd5b   : > { %3142 = vrcp.f32 %v1898_v39  ;;  %v1899_v46 = vadd.f32 1.0, %v1891_v41  ;;  %v1994_v56 = vsub.f32 0.0, %v1882_v31  ;;  %v1887_v58 = vand.u32 2147483647, %v3847_v53 }
 0xd5c   : > { %3144 = vrcp.f32 %v1900_v1  ;;  %v1901_v47 = vadd.f32 1.0, %v1893_v42  ;;  %v1894_v52 = vmul.f32 0.3275911, %v1886_v49  ;;  %v1896_v59 = vmul.f32 0.3275911, %v1888_v54 }
 0xd5d   : > { %3146 = vrcp.f32 %v1899_v46  ;;  %v3854_v60 = vmul.f32 0.70710677, %v3850_v55  ;;  %v1996_v62 = vsub.f32 0.0, %v1884_v32  ;;  %v1895_v63 = vmul.f32 0.3275911, %v1887_v58 }
 0xd5e   : > { %3148 = vrcp.f32 %v1901_v47  ;;  %v1902_v57 = vadd.f32 1.0, %v1894_v52  ;;  %v1995_v3 = vsub.f32 0.0, %v1883_v38  ;;  %v1904_v5 = vadd.f32 1.0, %v1896_v59 }
 0xd5f   : > { %v3857_v6 = vand.u32 2147483647, %v3854_v60  ;;  %v2002_v7 = vmul.f32 %v1994_v56, %v1882_v31  ;;  %v1903_v8 = vadd.f32 1.0, %v1895_v63  ;;  %v1997_v10 = vsub.f32 0.0, %v1885_v4 }
 0xd60   : > { %3150 = vrcp.f32 %v1902_v57  ;;  %v2004_v15 = vmul.f32 %v1996_v62, %v1884_v32  ;;  %v2003_v19 = vmul.f32 %v1995_v3, %v1883_v38  ;;  %v1998_v21 = vsub.f32 0.0, %v1886_v49 }
 0xd61   : > { %3152 = vrcp.f32 %v1904_v5  ;;  %v1897_v11 = vmul.f32 0.3275911, %v3857_v6  ;;  %v2010_v24 = vmul.f32 1.442695, %v2002_v7  ;;  %v2005_v29 = vmul.f32 %v1997_v10, %v1885_v4 }
 0xd62   : > { %3154 = vrcp.f32 %v1903_v8  ;;  %v2000_v30 = vsub.f32 0.0, %v1888_v54  ;;  %v2014_v35 = vmul.f32 1.442695, %v2004_v15  ;;  %v2012_v38 = vmul.f32 1.442695, %v2003_v19 }
 0xd63   : > { %v1905_v22 = vadd.f32 1.0, %v1897_v11  ;;  %v2006_v39 = vmul.f32 %v1998_v21, %v1886_v49  ;;  %v1999_v1 = vsub.f32 0.0, %v1887_v58  ;;  %v2016_v45 = vmul.f32 1.442695, %v2005_v29 }
 0xd64   : > { %v2008_v46 = vmul.f32 %v2000_v30, %v1888_v54  ;;  %v2001_v7 = vsub.f32 0.0, %v3857_v6  ;;  %vm2046_vm3 = vcmp.ge.f32.partialorder %v3836_v0, 0.0  ;;  %vm2043_vm5 = vcmp.ge.f32.partialorder %v3826_v33, 0.0 }
 0xd65   : > { %3156 = vrcp.f32 %v1905_v22  ;;  %v2018_v49 = vmul.f32 1.442695, %v2006_v39  ;;  %v2007_v59 = vmul.f32 %v1999_v1, %v1887_v58  ;;  %vm2045_vm7 = vcmp.ge.f32.partialorder %v3829_v34, 0.0 }
 0xd66   : > { %3158 = vpow2.f32 %v2010_v24  ;;  %v2022_v54 = vmul.f32 1.442695, %v2008_v46  ;;  %v2009_v30 = vmul.f32 %v2001_v7, %v3857_v6  ;;  %vm2048_vm8 = vcmp.ge.f32.partialorder %v3844_v51, 0.0 }
 0xd67   : > { %3160 = vpow2.f32 %v2014_v35  ;;  %v2020_v24 = vmul.f32 1.442695, %v2007_v59  ;;  %vm2047_vm9 = vcmp.ge.f32.partialorder %v3847_v53, 0.0  ;;  %v1866_v34 = vmul.f32 0.5, %v3809_v28 }
 0xd68   : > { %v3859_v9 = vpop.eup %3142  ;;  %3162 = vpow2.f32 %v2012_v38  ;;  %vm2049_vm10 = vcmp.ge.f32.partialorder %v3854_v60, 0.0  ;;  %v1873_v18 = vmul.f32 0.5, %v3850_v55 }
 0xd69   : > { %v3862_v12 = vpop.eup %3144  ;;  %v1922_v13 = vmul.f32 1.0614054, %v3859_v9  ;;  %3164 = vpow2.f32 %v2016_v45 }
 0xd6a   : > { %v1924_v17 = vmul.f32 1.0614054, %v3862_v12  ;;  %v3866_v25 = vpop.eup %3146  ;;  %3166 = vpow2.f32 %v2018_v49 }
 0xd6b   : > { %v1930_v23 = vadd.f32 -1.4531521, %v1922_v13  ;;  %v1923_v36 = vmul.f32 1.0614054, %v3866_v25  ;;  %v3870_v32 = vpop.eup %3148  ;;  %3168 = vpow2.f32 %v2022_v54 }
 0xd6c   : > { %v1932_v26 = vadd.f32 -1.4531521, %v1924_v17  ;;  %v1925_v27 = vmul.f32 1.0614054, %v3870_v32  ;;  %3170 = vpow2.f32 %v2020_v24 }
 0xd6d   : > { %v1938_v31 = vmul.f32 %v3859_v9, %v1930_v23  ;;  %v1931_v42 = vadd.f32 -1.4531521, %v1923_v36  ;;  %v3876_v56 = vpop.eup %3150 }
 0xd6e   : > { %v1940_v37 = vmul.f32 %v3862_v12, %v1932_v26  ;;  %v1933_v52 = vadd.f32 -1.4531521, %v1925_v27  ;;  %v1926_v5 = vmul.f32 1.0614054, %v3876_v56  ;;  %v3882_v8 = vpop.eup %3152 }
 0xd6f   : > { %v1946_v41 = vadd.f32 1.4214138, %v1938_v31  ;;  %v1939_v50 = vmul.f32 %v3866_v25, %v1931_v42  ;;  %v3886_v17 = vpop.eup %3154  ;;  %v1928_v19 = vmul.f32 1.0614054, %v3882_v8 }
 0xd70   : > { %v1948_v4 = vadd.f32 1.4214138, %v1940_v37  ;;  %v1941_v3 = vmul.f32 %v3870_v32, %v1933_v52  ;;  %v1934_v15 = vadd.f32 -1.4531521, %v1926_v5  ;;  %v1927_v29 = vmul.f32 1.0614054, %v3886_v17 }
 0xd71   : > { %v1954_v47 = vmul.f32 %v3859_v9, %v1946_v41  ;;  %v1947_v63 = vadd.f32 1.4214138, %v1939_v50  ;;  %v1936_v26 = vadd.f32 -1.4531521, %v1928_v19  ;;  %v2024_v50 = vmul.f32 1.442695, %v2009_v30 }
 0xd72   : > { %v1956_v57 = vmul.f32 %v3862_v12, %v1948_v4  ;;  %v1949_v13 = vadd.f32 1.4214138, %v1941_v3  ;;  %v1942_v23 = vmul.f32 %v3876_v56, %v1934_v15  ;;  %v3893_v31 = vpop.eup %3156  ;;  %v1935_v41 = vadd.f32 -1.4531521, %v1927_v29 }
 0xd73   : > { %v1962_v62 = vadd.f32 -0.28449672, %v1954_v47  ;;  %v1955_v11 = vmul.f32 %v3866_v25, %v1947_v63  ;;  %v1944_v1 = vmul.f32 %v3882_v8, %v1936_v26  ;;  %v1929_v42 = vmul.f32 1.0614054, %v3893_v31  ;;  %v3159_v52 = vpop.eup %3158 }
 0xd74   : > { %v1964_v58 = vadd.f32 -0.28449672, %v1956_v57  ;;  %v1957_v22 = vmul.f32 %v3870_v32, %v1949_v13  ;;  %v1950_v38 = vadd.f32 1.4214138, %v1942_v23  ;;  %v1943_v46 = vmul.f32 %v3886_v17, %v1935_v41  ;;  %v3161_v63 = vpop.eup %3160 }
 0xd75   : > { %v1970_v10 = vmul.f32 %v3859_v9, %v1962_v62  ;;  %v1963_v21 = vadd.f32 -0.28449672, %v1955_v11  ;;  %v1952_v6 = vadd.f32 1.4214138, %v1944_v1  ;;  %v1937_v47 = vadd.f32 -1.4531521, %v1929_v42 }
 0xd76   : > { %v1965_v37 = vadd.f32 -0.28449672, %v1957_v22  ;;  %v1972_v39 = vmul.f32 %v3862_v12, %v1964_v58  ;;  %v1958_v45 = vmul.f32 %v3876_v56, %v1950_v38  ;;  %v1951_v54 = vadd.f32 1.4214138, %v1943_v46 }
 0xd77   : > { %v1978_v35 = vadd.f32 0.2548296, %v1970_v10  ;;  %v1971_v36 = vmul.f32 %v3866_v25, %v1963_v21  ;;  %v1960_v5 = vmul.f32 %v3882_v8, %v1952_v6  ;;  %v1945_v7 = vmul.f32 %v3893_v31, %v1937_v47  ;;  %v3163_v10 = vpop.eup %3162 }
 0xd78   : > { %v1973_v4 = vmul.f32 %v3870_v32, %v1965_v37  ;;  %v1966_v62 = vadd.f32 -0.28449672, %v1958_v45  ;;  %v1980_v3 = vadd.f32 0.2548296, %v1972_v39  ;;  %v1959_v58 = vmul.f32 %v3886_v17, %v1951_v54 }
 0xd79   : > { %v1979_v27 = vadd.f32 0.2548296, %v1971_v36  ;;  %v1986_v57 = vmul.f32 %v3859_v9, %v1978_v35  ;;  %v1968_v15 = vadd.f32 -0.28449672, %v1960_v5  ;;  %v1953_v19 = vadd.f32 1.4214138, %v1945_v7  ;;  %v3165_v9 = vpop.eup %3164 }
 0xd7a   : > { %v1981_v59 = vadd.f32 0.2548296, %v1973_v4  ;;  %v1974_v11 = vmul.f32 %v3876_v56, %v1966_v62  ;;  %3172 = vpow2.f32 %v2024_v50  ;;  %v1988_v23 = vmul.f32 %v3862_v12, %v1980_v3  ;;  %v3167_v29 = vpop.eup %3166 }
 0xd7b   : > { %v1987_v49 = vmul.f32 %v3866_v25, %v1979_v27  ;;  %v2026_v21 = vmul.f32 %v3159_v52, %v1986_v57  ;;  %v1976_v24 = vmul.f32 %v3882_v8, %v1968_v15  ;;  %v1967_v26 = vadd.f32 -0.28449672, %v1959_v58  ;;  %v3169_v39 = vpop.eup %3168 }
 0xd7c   : > { %v1989_v25 = vmul.f32 %v3870_v32, %v1981_v59  ;;  %v1982_v22 = vadd.f32 0.2548296, %v1974_v11  ;;  %v1961_v38 = vmul.f32 %v3893_v31, %v1953_v19  ;;  %v2028_v42 = vmul.f32 %v3161_v63, %v1988_v23  ;;  %v3171_v6 = vpop.eup %3170 }
 0xd7d   : > { %v2027_v13 = vmul.f32 %v3163_v10, %v1987_v49  ;;  %v1984_v36 = vadd.f32 0.2548296, %v1976_v24  ;;  %v1975_v37 = vmul.f32 %v3886_v17, %v1967_v26  ;;  %v2034_v1 = vsub.f32 1.0, %v2026_v21 }
 0xd7e   : > { %v1990_v30 = vmul.f32 %v3876_v56, %v1982_v22  ;;  %v2029_v41 = vmul.f32 %v3165_v9, %v1989_v25  ;;  %v1969_v4 = vadd.f32 -0.28449672, %v1961_v38  ;;  %v2036_v59 = vsub.f32 1.0, %v2028_v42 }
 0xd7f   : > { %v2035_v35 = vsub.f32 1.0, %v2027_v13  ;;  %v1992_v27 = vmul.f32 %v3882_v8, %v1984_v36  ;;  %v1983_v12 = vadd.f32 0.2548296, %v1975_v37  ;;  %v2050_v50 = vsub.f32 0.0, %v2034_v1 }
 0xd80   : > { %v2030_v32 = vmul.f32 %v3167_v29, %v1990_v30  ;;  %v2037_v52 = vsub.f32 1.0, %v2029_v41  ;;  %v1977_v49 = vmul.f32 %v3893_v31, %v1969_v4  ;;  %v1867_v10 = vmul.f32 0.5, %v3819_v16 }
 0xd81   : > { %v2051_v46 = vsub.f32 0.0, %v2035_v35  ;;  %v2032_v47 = vmul.f32 %v3169_v39, %v1992_v27  ;;  %v1991_v56 = vmul.f32 %v3886_v17, %v1983_v12  ;;  %v2058_v7 = vsel %vm2042_vm4, %v2034_v1, %v2050_v50 }
 0xd82   : > { %v2038_v45 = vsub.f32 1.0, %v2030_v32  ;;  %v1985_v3 = vadd.f32 0.2548296, %v1977_v49  ;;  %v2053_v11 = vsub.f32 0.0, %v2037_v52  ;;  %v2052_v15 = vsub.f32 0.0, %v2036_v59 }
 0xd83   : > { %v2040_v62 = vsub.f32 1.0, %v2032_v47  ;;  %v2031_v63 = vmul.f32 %v3171_v6, %v1991_v56  ;;  %v2059_v5 = vsel %vm2043_vm5, %v2035_v35, %v2051_v46  ;;  %v2066_v9 = vadd.f32 1.0, %v2058_v7 }
 0xd84   : > { %v2054_v57 = vsub.f32 0.0, %v2038_v45  ;;  %v1993_v13 = vmul.f32 %v3893_v31, %v1985_v3  ;;  %v2067_v33 = vadd.f32 1.0, %v2059_v5  ;;  %v1870_v21 = vmul.f32 0.5, %v3833_v43 }
 0xd85   : > { %v2056_v17 = vsub.f32 0.0, %v2040_v62  ;;  %v2039_v54 = vsub.f32 1.0, %v2031_v63  ;;  %v2061_v22 = vsel %vm2045_vm7, %v2037_v52, %v2053_v11  ;;  %v1871_v31 = vmul.f32 0.5, %v3840_v48 }
 0xd86   : > { %v2062_v8 = vsel %vm2046_vm3, %v2038_v45, %v2054_v57  ;;  %v2060_v26 = vsel %vm2044_vm6, %v2036_v59, %v2052_v15  ;;  %v2075_v51 = vmul.f32 %v2067_v33, %v1867_v10  ;;  %v2074_v36 = vmul.f32 %v2066_v9, %v1866_v34 }
 0xd87   : > { %v3173_v0 = vpop.eup %3172  ;;  %v2070_v14 = vadd.f32 1.0, %v2062_v8  ;;  %v2055_v58 = vsub.f32 0.0, %v2039_v54  ;;  %v2064_v25 = vsel %vm2048_vm8, %v2040_v62, %v2056_v17  ;;  %v2069_v37 = vadd.f32 1.0, %v2061_v22 }
 0xd88   : > { %v2033_v19 = vmul.f32 %v3173_v0, %v1993_v13  ;;  %v2072_v30 = vadd.f32 1.0, %v2064_v25  ;;  %v2068_v43 = vadd.f32 1.0, %v2060_v26  ;;  %v1872_v38 = vmul.f32 0.5, %v3838_v2 }
 0xd89   : > { %v2063_v16 = vsel %vm2047_vm9, %v2039_v54, %v2055_v58  ;;  %v2078_v29 = vmul.f32 %v2070_v14, %v1870_v21  ;;  %v1869_v1 = vmul.f32 0.5, %v3821_v20  ;;  %v1868_v32 = vmul.f32 0.5, %v3811_v61  ;;  %v2658_v20 = vld [vmem:[%s4003_s11] ss:$0 sm:$0xff] }
 0xd8a   : > { %v2071_v23 = vadd.f32 1.0, %v2063_v16  ;;  %v2041_v24 = vsub.f32 1.0, %v2033_v19  ;;  %v2080_v42 = vmul.f32 %v2072_v30, %v1872_v38 }
 0xd8b   : > { %v2082_v28 = vpack.c.bf16 %v2078_v29, %v2074_v36  ;;  %v2077_v27 = vmul.f32 %v2069_v37, %v1869_v1  ;;  %v2076_v4 = vmul.f32 %v2068_v43, %v1868_v32 }
 0xd8c   : > { %v2079_v53 = vmul.f32 %v2071_v23, %v1871_v31  ;;  %v2057_v35 = vsub.f32 0.0, %v2041_v24 }
 0xd8d   : > { %v2084_v45 = vpack.c.bf16 %v2080_v42, %v2076_v4 }
 0xd8e   : > { %v2065_v48 = vsel %vm2049_vm10, %v2041_v24, %v2057_v35  ;;  %v2083_v39 = vpack.c.bf16 %v2079_v53, %v2075_v51 }
 0xd8f   : > { %v2073_v41 = vadd.f32 1.0, %v2065_v48 }
 0xd90   : > { %2381 = vmatprep.mubr.bf16.mxu0 %v2083_v39 }
 0xd91   : > { %v2081_v12 = vmul.f32 %v2073_v41, %v1873_v18  ;;  %2382 = vmatmul.mubr.bf16.vlgmr.msra.gmra.mxu0 %v2082_v28 }
 0xd93   : > { %v2085_v60 = vpack.c.bf16 %v2081_v12, %v2077_v27 }
 0xd95   : > { %2422 = vmatprep.mubr.bf16.mxu1 %v2085_v60 }
 0xd96   : > { %2423 = vmatmul.mubr.bf16.vlgmr.msra.gmra.mxu1 %v2084_v45 }
 0xe51   : > { %v2751_v2 = vpop.f32.mrf.mxu0 }
 0xe53   : > { %v2752_v6 = vpop.f32.mrf.mxu0 }
 0xe54   : > { %v2753_v55 = vadd.f32 %v2752_v6, %v2751_v2 }
 0xe55   : > { %v2754_v61 = vpop.f32.mrf.mxu0 }
 0xe56   : > { %v2773_v46 = vpop.f32.mrf.mxu1  ;;  %v2384_v47 = vadd.f32 %v2753_v55, %v2658_v20 }
 0xe57   : > { %v2755_v56 = vpop.f32.mrf.mxu0 }
 0xe58   : > { %v2774_v50 = vpop.f32.mrf.mxu1  ;;  %v2756_v52 = vadd.f32 %v2755_v56, %v2754_v61 }
 0xe59   : > { %v2775_v57 = vadd.f32 %v2774_v50, %v2773_v46 }
 0xe5a   : > { %v2776_v49 = vpop.f32.mrf.mxu1  ;;  %v2387_v62 = vadd.f32 %v2756_v52, %v2658_v20 }
 0xe5b   : > { %v2425_v59 = vadd.f32 %v2775_v57, %v2384_v47 }
 0xe5c   : > { %v2777_v63 = vpop.f32.mrf.mxu1 }
 0xe5d   : > { %v2431_v8 = vadd.f32 %v2425_v59, %v3781_v40  ;;  %v2778_v3 = vadd.f32 %v2777_v63, %v2776_v49 }
 0xe5f   : > { %2433 = vst [vmem:[%s489_s14] sm:$0xff] %v2431_v8  ;;  %v2428_v5 = vadd.f32 %v2778_v3, %v2387_v62 }
 0xe61   : > { %v2432_v17 = vadd.f32 %v2428_v5, %v3785_v44 }
 0xe63   : > { %2434 = vst [vmem:[%s489_s14 + $0x8] sm:$0xff] %v2432_v17 }
 0xe64   : > { %3320 = shalt.err (!%p3317_p2)
}
 0xe65   : > { %s3321_s1 = scalar_lea.hbm %s3948_s2, 256  ;;  %s3325_s17 = scalar_lea.hbm %s4004_s12, 512 }
 0xe66   : > { %p3322_p3 = scmp.ne.s32.totalorder %s3948_s2, %s3321_s1  ;;  %p3326_p0 = scmp.lt.s32.totalorder %s3948_s2, %s4004_s12 }
 0xe67   : > { %p3327_p11 = scmp.lt.s32.totalorder %s3325_s17, %s3321_s1 }
 0xe68   : > { %p3323_p4 = pnand %p3322_p3, %p4034_p7 }
 0xe69   : > { %p3328_p6 = por %p3327_p11, %p3326_p0 }
 0xe6a   : > { %p3324_p8 = pneg %p3323_p4 }
 0xe6c   : > { %p3329_p12 = pnand %p3328_p6, %p3324_p8 }
 0xe6e   : > { %3332 = shalt.err (!%p3329_p12)
}
 0xe6f   : > { %s3401_s16 = smov 128   ;;  %s3402_s20 = smov 8  }
 0xe70   : > { %2897 = dma.vmem_to_hbm [thread:$0]  (%p4034_p7), %s3943_s19, 256, %s3948_s2, %s2436_s4, %s3401_s16, %s3401_s16, %s3402_s20  }
 0xe71 PF: > { %s4035_s26 = sld [smem:[#allocation16_spill]]  ;;  %p4038_p13 = scmp.ge.s32.totalorder %s3379_s24, 2 }
 0xe72   : > { %s4036_s25 = sld [smem:[#allocation17_spill]] }
 0xe77   : > { %s2464_s15 = sand.u32 1, %s4035_s26  }
 0xe78   : > { %p4037_p9 = scmp.ne.s32.totalorder %s4036_s25, 0  ;;  %s2465_s30 = scalar_lea.sflag [#allocation4], %s2464_s15 }
 0xe7a   : > { %p2917_p5 = pnand %p4038_p13, %p4037_p9 }
 0xe7c   : > { %p2918_p10 = pneg %p2917_p5 }
 0xe7e   : > { %3362 = dma.done.wait (%p2918_p10), %s2465_s30, 256  }
 0xe7f   : > { %3364 = vsyncadd (%p2918_p10), %s2465_s30, 4294967040  ;;  %p27_p1 = scmp.ge.s32.totalorder %s3556_s18, 4   ;;  %s4039_s21 = smov %s3371_s22 }
 0xe80   : > { %s4040_s22 = smov %s3375_s23  ;;  %s4041_s23 = smov %s3572_s28 }
 0xe81   : > { %s4042_s24 = smov %s3556_s18  ;;  %29 = sbr.rel (!%p27_p1) target bundleno = 12 (0xc), region = 129 }
 0xe86   :  { %2470 = vsyncpa [#allocation3], 1 }
 0xe87   :  { %2472 = vsyncpa [#allocation3 + $0x1], 1 }
 0xe88   :  { %2473 = vsyncpa [#allocation6], 1 }
 0xe89   :  { %2474 = vsyncpa [#allocation9], 1 }
 0xe8a   :  { %2475 = vsyncpa [#allocation4], 1 }
 0xe8b   :  { %2477 = vsyncpa [#allocation4 + $0x1], 1 }

</bundles_post_ra>
